<compile_context>
chip_gen: v7x
topology: tpu7x:2x2x1
jax: 0.10.0
libtpu: 0.0.40
codegen_flags: <defaults>
</compile_context>

<pallas_src>
import jax
import jax.numpy as jnp
from jax.experimental import pallas as pl
from jax.experimental.pallas import tpu as pltpu


def _tpu_generation():
    """Best-effort TPU generation (4, 5, 6, 7, ...); defaults to 6."""
    kind = ""
    try:
        kind = str(jax.devices()[0].device_kind)
    except Exception:
        pass
    digits = [c for c in kind if c.isdigit()]
    if digits:
        try:
            return int(digits[0])
        except ValueError:
            pass
    return 6


def _packed_mlp_kernel(x_ref, w1_ref, w2_ref, w3_ref, bias_ref, o_ref):
    # x_ref:    (G, DIN, TN)  lane-major points for G meta-batch elements (f32)
    # w1_ref:   (G, H, DIN)   per-element W1^T (f32, consumed by the VPU)
    # w2_ref:   (G*H, G*H)    block-diagonal packed W2^T (bf16, MXU)
    # w3_ref:   (G, G*H)      packed W3^T rows (bf16, MXU)
    # bias_ref: (G, H, 3)     col0 = b1, col1 = b2, col2 = b3 (bcast over H)
    # o_ref:    (G, TN)       lane-dense output tile
    g_dim, din, tn = x_ref.shape
    h_dim = w1_ref.shape[1]
    gh = g_dim * h_dim

    x = x_ref[...]
    w1 = w1_ref[...]
    bias = bias_ref[...]
    b1 = bias[:, :, 0:1]                     # (G, H, 1)   f32
    b2 = bias[:, :, 1:2].reshape(gh, 1)      # (G*H, 1)    f32
    b3 = bias[:, 0, 2:3]                     # (G, 1)      f32

    # Layer 1: K = DIN (=3) contraction as DIN VPU FMAs over lane-dense
    # (G, H, TN) tiles; keeps the MXU free for layer 2 and stays f32
    # (v5e has no bf16 VPU path, and this preserves precision).
    if din <= 8:
        h1 = b1
        for k in range(din):                 # static, unrolled
            h1 = h1 + w1[:, :, k:k + 1] * x[:, k:k + 1, :]
        h1 = h1.reshape(gh, tn)
    else:
        h1 = jnp.concatenate(
            [jnp.dot(w1[g].astype(w2_ref.dtype), x[g].astype(w2_ref.dtype),
                     preferred_element_type=jnp.float32)
             for g in range(g_dim)],
            axis=0) + b1.reshape(gh, 1)
    h1 = jnp.maximum(h1, 0.0)                # (G*H, TN) f32

    # Layer 2: block-diagonal (G*H, G*H) bf16 MXU dot, f32 accumulation.
    h2 = jnp.dot(w2_ref[...], h1.astype(w2_ref.dtype),
                 preferred_element_type=jnp.float32) + b2
    h2 = jnp.maximum(h2, 0.0)                # (G*H, TN) f32

    # Layer 3 folded into the packed scheme: (G, G*H) @ (G*H, TN) gives a
    # lane-dense (G, TN) output tile (no M=1 MXU dot per element).
    out = jnp.dot(w3_ref[...], h2.astype(w3_ref.dtype),
                  preferred_element_type=jnp.float32) + b3
    o_ref[...] = out.astype(o_ref.dtype)


def meta_sdf_forward(points, context_params, *, tile_n=None, group_size=None,
                     lane_major=False):
    """MetaSDF.forward(points, context_params) -> sdf of shape [B, N, 1].

    points: [B, N, DIN]  (or [B, DIN, N] with lane_major=True, which skips
            the wrapper-side HBM transpose of the dominant points stream)
    context_params: dict of batched hypo-net params
            w1 [B,DIN,H]  b1 [B,1,H]   w2 [B,H,H]  b2 [B,1,H]
            w3 [B,H,1]    b3 [B,1,1]
    """
    w1, b1 = context_params["w1"], context_params["b1"]
    w2, b2 = context_params["w2"], context_params["b2"]
    w3, b3 = context_params["w3"], context_params["b3"]

    if lane_major:
        B, DIN, N = points.shape
        points_t = points
    else:
        B, N, DIN = points.shape
        # NOTE: a full extra HBM read+write of the points stream; pass
        # lane_major=True with (B, DIN, N) points to avoid it.
        points_t = jnp.swapaxes(points, 1, 2)           # (B, DIN, N)

    H = w1.shape[-1]
    assert H % 8 == 0, "hidden width must be a multiple of 8"
    assert N % 128 == 0, "number of points must be a multiple of 128"

    gen = _tpu_generation()

    # ---- meta-batch packing factor G (fills the MXU) -------------------------
    if group_size is None:
        mxu_width = 256 if gen >= 6 else 128            # v6e/v7x : v4/v5
        group_size = max(1, mxu_width // H)
    G = max(1, min(int(group_size), B))
    while B % G != 0:                                    # G must divide B
        G -= 1
    Bg = B // G
    GH = G * H

    # ---- point-tile size ------------------------------------------------------
    # Large tiles amortize the ~0.35 us/grid-step overhead; v7x only has
    # 64 MiB VMEM per TensorCore, so it gets a smaller default.
    if tile_n is None:
        tile_n = 4096 if gen >= 7 else 8192
    tile_n = max(128, min(int(tile_n), N))
    tile_n -= tile_n % 128                               # multiple of 128 lanes
    tile_n = max(tile_n, 128)
    while N % tile_n != 0:                               # terminates: N%128==0
        tile_n -= 128
    # NOTE: awkward N (e.g. 128*prime) degrades to small tiles; pad N upstream
    # if that matters.

    # v7x has 2 TensorCores: ensure >= 2 parallel grid steps (only there).
    if gen >= 7 and Bg * (N // tile_n) < 2 and tile_n % 256 == 0:
        tile_n //= 2

    # ---- pack parameters (wrapper-side, tiny) ---------------------------------
    mxu_dtype = jnp.bfloat16           # MXU operands; accumulation stays f32
    f32 = jnp.float32

    w1t = jnp.swapaxes(w1, 1, 2)                         # (B, H, DIN)
    w2t = jnp.swapaxes(w2, 1, 2)                         # (B, H, H)
    w3t = jnp.swapaxes(w3, 1, 2)                         # (B, 1, H)

    points_g = points_t.reshape(Bg, G, DIN, N)
    w1_g = w1t.reshape(Bg, G, H, DIN).astype(f32)

    # Block-diagonal packed W2^T: one (G*H, G*H) matrix per meta-batch group.
    w2_blk = w2t.reshape(Bg, G, H, H).astype(mxu_dtype)
    w2_bd = jnp.zeros((Bg, GH, GH), mxu_dtype)
    for g in range(G):
        w2_bd = w2_bd.at[:, g * H:(g + 1) * H, g * H:(g + 1) * H].set(w2_blk[:, g])

    # Packed W3^T: row g holds W3[g]^T in columns [g*H, (g+1)*H).
    w3_blk = w3t.reshape(Bg, G, 1, H).astype(mxu_dtype)
    w3_p = jnp.zeros((Bg, G, GH), mxu_dtype)
    for g in range(G):
        w3_p = w3_p.at[:, g:g + 1, g * H:(g + 1) * H].set(w3_blk[:, g])

    # All biases in one block (fewer DMA streams): col0=b1, col1=b2, col2=b3.
    bias_g = jnp.stack(
        [b1.reshape(Bg, G, H),
         b2.reshape(Bg, G, H),
         jnp.broadcast_to(b3, (B, 1, H)).reshape(Bg, G, H)],
        axis=-1).astype(f32)                             # (Bg, G, H, 3)

    grid = (Bg, N // tile_n)
    vmem_limit = (48 << 20) if gen >= 7 else (64 << 20)

    out = pl.pallas_call(
        _packed_mlp_kernel,
        out_shape=jax.ShapeDtypeStruct((Bg, G, N), points.dtype),
        grid_spec=pltpu.PrefetchScalarGridSpec(
            num_scalar_prefetch=0,
            grid=grid,
            in_specs=[
                # points tile: group dim whole, tile over points (lanes).
                pl.BlockSpec((None, G, DIN, tile_n), lambda b, n: (b, 0, 0, n)),
                # Parameter blocks: block index constant along the fast n axis
                # so they only re-DMA when the meta-batch group changes.
                # Default double-buffering accepted consciously: packed W2 is
                # only (G*H)^2 * 2 bytes (128 KiB at G*H = 256).
                pl.BlockSpec((None, G, H, DIN), lambda b, n: (b, 0, 0, 0)),
                pl.BlockSpec((None, GH, GH), lambda b, n: (b, 0, 0)),
                pl.BlockSpec((None, G, GH), lambda b, n: (b, 0, 0)),
                pl.BlockSpec((None, G, H, 3), lambda b, n: (b, 0, 0, 0)),
            ],
            out_specs=pl.BlockSpec((None, G, tile_n), lambda b, n: (b, 0, n)),
        ),
        compiler_params=pltpu.CompilerParams(
            dimension_semantics=("parallel", "parallel"),
            vmem_limit_bytes=vmem_limit),
    )(points_g, w1_g, w2_bd, w3_p, bias_g)

    # (Bg, G, N) is row-major identical to (B, N): free reshape to [B, N, 1].
    return out.reshape(B, N, 1)


def _reference_forward(points, p, mxu_dtype=None):
    """Plain-JAX hypo-net forward.  If mxu_dtype is given, emulate the
    kernel's numerics (bf16 MXU operands, f32 accumulation)."""
    hi = jax.lax.Precision.HIGHEST

    def q(x):
        if mxu_dtype is None:
            return x
        return x.astype(mxu_dtype).astype(jnp.float32)

    h1 = jnp.maximum(
        jnp.einsum("bnd,bdh->bnh", points, p["w1"], precision=hi) + p["b1"], 0.0)
    h2 = jnp.maximum(
        jnp.einsum("bnh,bhk->bnk", q(h1), q(p["w2"]), precision=hi) + p["b2"], 0.0)
    return jnp.einsum("bnh,bhk->bnk", q(h2), q(p["w3"]), precision=hi) + p["b3"]


def _init_context_params(key, meta_batch, din, hidden):
    """Per-meta-batch-element ("fast") hypo-net parameters, as produced by
    generate_params() after the inner adaptation steps (each meta-batch
    element carries its own weights — this also exercises the block-diagonal
    packing with distinct per-element parameters)."""
    ks = jax.random.split(key, 6)

    def rnd(k, shape, scale):
        return scale * jax.random.normal(k, shape, jnp.float32)

    return {
        "w1": rnd(ks[0], (meta_batch, din, hidden), 1.0 / din ** 0.5),
        "b1": rnd(ks[1], (meta_batch, 1, hidden), 0.1),
        "w2": rnd(ks[2], (meta_batch, hidden, hidden), 1.0 / hidden ** 0.5),
        "b2": rnd(ks[3], (meta_batch, 1, hidden), 0.1),
        "w3": rnd(ks[4], (meta_batch, hidden, 1), 1.0 / hidden ** 0.5),
        "b3": rnd(ks[5], (meta_batch, 1, 1), 0.1),
    }


if __name__ == "__main__":
    META_BATCH = 2      # meta batch size
    NUM_POINTS = 1024   # points per SDF
    DIN = 3             # 3D coordinates
    HIDDEN = 32         # hypo-net hidden width

    key = jax.random.PRNGKey(0)
    kp, kw = jax.random.split(key)

    points = jax.random.normal(kp, (META_BATCH, NUM_POINTS, DIN), jnp.float32)
    context_params = _init_context_params(kw, META_BATCH, DIN, HIDDEN)

    sdf = jax.block_until_ready(jax.jit(meta_sdf_forward)(points, context_params))
    assert sdf.shape == (META_BATCH, NUM_POINTS, 1)

    # Reference that matches the kernel's numerics (bf16 MXU operands, f32
    # accumulation) — tight check.
    ref_bf16 = _reference_forward(points, context_params, mxu_dtype=jnp.bfloat16)
    max_err = float(jnp.max(jnp.abs(sdf - ref_bf16)))
    assert jnp.allclose(sdf, ref_bf16, atol=2e-2, rtol=2e-2), (
        f"mismatch vs bf16-matched reference (max abs err {max_err:.3e})")

    # Loose sanity check against the pure-f32 reference (bounds the bf16
    # quantization error introduced by the MXU operand cast).
    ref_f32 = _reference_forward(points, context_params)
    assert jnp.allclose(sdf, ref_f32, atol=2.5e-1, rtol=5e-2)

    print("KERNEL_OK")
</pallas_src>

<mosaic_0001>
module attributes {stable_mosaic.version = 11 : i64} {
  func.func @_packed_mlp_kernel(%arg0: i32, %arg1: i32, %arg2: memref<1x2x3x1024xf32, #tpu.memory_space<vmem>>, %arg3: memref<1x2x32x3xf32, #tpu.memory_space<vmem>>, %arg4: memref<1x64x64xbf16, #tpu.memory_space<vmem>>, %arg5: memref<1x2x64xbf16, #tpu.memory_space<vmem>>, %arg6: memref<1x2x32x3xf32, #tpu.memory_space<vmem>>, %arg7: memref<1x2x1024xf32, #tpu.memory_space<vmem>>) attributes {dimension_semantics = [#tpu.dimension_semantics<parallel>, #tpu.dimension_semantics<parallel>], iteration_bounds = array<i64: 1, 1>, scalar_prefetch = 0 : i64, scratch_operands = 0 : i64, tpu.core_type = #tpu.core_type<tc>, window_params = [{transform_indices = @transform_0, window_bounds = array<i64: 1, 2, 3, 1024>}, {transform_indices = @transform_1, window_bounds = array<i64: 1, 2, 32, 3>}, {transform_indices = @transform_2, window_bounds = array<i64: 1, 64, 64>}, {transform_indices = @transform_3, window_bounds = array<i64: 1, 2, 64>}, {transform_indices = @transform_4, window_bounds = array<i64: 1, 2, 32, 3>}, {transform_indices = @transform_5, window_bounds = array<i64: 1, 2, 1024>}]} {
    %c0 = arith.constant 0 : index
    %c0_0 = arith.constant 0 : index
    %c0_1 = arith.constant 0 : index
    %c0_2 = arith.constant 0 : index
    %0 = vector.load %arg2[%c0, %c0_0, %c0_1, %c0_2] : memref<1x2x3x1024xf32, #tpu.memory_space<vmem>>, vector<1x2x3x1024xf32>
    %1 = vector.shape_cast %0 : vector<1x2x3x1024xf32> to vector<2x3x1024xf32>
    %c0_3 = arith.constant 0 : index
    %c0_4 = arith.constant 0 : index
    %c0_5 = arith.constant 0 : index
    %c0_6 = arith.constant 0 : index
    %2 = vector.load %arg3[%c0_3, %c0_4, %c0_5, %c0_6] : memref<1x2x32x3xf32, #tpu.memory_space<vmem>>, vector<1x2x32x3xf32>
    %3 = vector.shape_cast %2 : vector<1x2x32x3xf32> to vector<2x32x3xf32>
    %c0_7 = arith.constant 0 : index
    %c0_8 = arith.constant 0 : index
    %c0_9 = arith.constant 0 : index
    %c0_10 = arith.constant 0 : index
    %4 = vector.load %arg6[%c0_7, %c0_8, %c0_9, %c0_10] : memref<1x2x32x3xf32, #tpu.memory_space<vmem>>, vector<1x2x32x3xf32>
    %5 = vector.shape_cast %4 : vector<1x2x32x3xf32> to vector<2x32x3xf32>
    %6 = vector.extract_strided_slice %5 {offsets = [0, 0, 0], sizes = [2, 32, 1], strides = [1, 1, 1]} : vector<2x32x3xf32> to vector<2x32x1xf32>
    %7 = vector.extract_strided_slice %5 {offsets = [0, 0, 1], sizes = [2, 32, 1], strides = [1, 1, 1]} : vector<2x32x3xf32> to vector<2x32x1xf32>
    %8 = vector.shape_cast %7 : vector<2x32x1xf32> to vector<64x1xf32>
    %9 = vector.extract_strided_slice %5 {offsets = [0, 0, 2], sizes = [2, 1, 1], strides = [1, 1, 1]} : vector<2x32x3xf32> to vector<2x1x1xf32>
    %10 = vector.shape_cast %9 : vector<2x1x1xf32> to vector<2x1xf32>
    %11 = vector.extract_strided_slice %3 {offsets = [0, 0, 0], sizes = [2, 32, 1], strides = [1, 1, 1]} : vector<2x32x3xf32> to vector<2x32x1xf32>
    %12 = vector.extract_strided_slice %1 {offsets = [0, 0, 0], sizes = [2, 1, 1024], strides = [1, 1, 1]} : vector<2x3x1024xf32> to vector<2x1x1024xf32>
    %13 = vector.broadcast %11 : vector<2x32x1xf32> to vector<2x32x1024xf32>
    %14 = vector.broadcast %12 : vector<2x1x1024xf32> to vector<2x32x1024xf32>
    %15 = arith.mulf %13, %14 : vector<2x32x1024xf32>
    %16 = vector.broadcast %6 : vector<2x32x1xf32> to vector<2x32x1024xf32>
    %17 = arith.addf %16, %15 : vector<2x32x1024xf32>
    %18 = vector.extract_strided_slice %3 {offsets = [0, 0, 1], sizes = [2, 32, 1], strides = [1, 1, 1]} : vector<2x32x3xf32> to vector<2x32x1xf32>
    %19 = vector.extract_strided_slice %1 {offsets = [0, 1, 0], sizes = [2, 1, 1024], strides = [1, 1, 1]} : vector<2x3x1024xf32> to vector<2x1x1024xf32>
    %20 = vector.broadcast %18 : vector<2x32x1xf32> to vector<2x32x1024xf32>
    %21 = vector.broadcast %19 : vector<2x1x1024xf32> to vector<2x32x1024xf32>
    %22 = arith.mulf %20, %21 : vector<2x32x1024xf32>
    %23 = arith.addf %17, %22 : vector<2x32x1024xf32>
    %24 = vector.extract_strided_slice %3 {offsets = [0, 0, 2], sizes = [2, 32, 1], strides = [1, 1, 1]} : vector<2x32x3xf32> to vector<2x32x1xf32>
    %25 = vector.extract_strided_slice %1 {offsets = [0, 2, 0], sizes = [2, 1, 1024], strides = [1, 1, 1]} : vector<2x3x1024xf32> to vector<2x1x1024xf32>
    %26 = vector.broadcast %24 : vector<2x32x1xf32> to vector<2x32x1024xf32>
    %27 = vector.broadcast %25 : vector<2x1x1024xf32> to vector<2x32x1024xf32>
    %28 = arith.mulf %26, %27 : vector<2x32x1024xf32>
    %29 = arith.addf %23, %28 : vector<2x32x1024xf32>
    %30 = vector.shape_cast %29 : vector<2x32x1024xf32> to vector<64x1024xf32>
    %cst = arith.constant 0.000000e+00 : f32
    %31 = vector.broadcast %cst : f32 to vector<64x1024xf32>
    %32 = arith.maximumf %30, %31 : vector<64x1024xf32>
    %c0_11 = arith.constant 0 : index
    %c0_12 = arith.constant 0 : index
    %c0_13 = arith.constant 0 : index
    %33 = vector.load %arg4[%c0_11, %c0_12, %c0_13] : memref<1x64x64xbf16, #tpu.memory_space<vmem>>, vector<1x64x64xbf16>
    %34 = vector.shape_cast %33 : vector<1x64x64xbf16> to vector<64x64xbf16>
    %35 = arith.truncf %32 : vector<64x1024xf32> to vector<64x1024xbf16>
    %cst_14 = arith.constant dense<0.000000e+00> : vector<64x1024xf32>
    %36 = tpu.matmul %34, %35, %cst_14 {dimension_numbers = #tpu.dot_dimension_numbers<[1], [0], [0], [1], [0, 0, 1, 1], [], []>} : vector<64x64xbf16>, vector<64x1024xbf16>, vector<64x1024xf32> -> vector<64x1024xf32>
    %37 = vector.broadcast %8 : vector<64x1xf32> to vector<64x1024xf32>
    %38 = arith.addf %36, %37 : vector<64x1024xf32>
    %cst_15 = arith.constant 0.000000e+00 : f32
    %39 = vector.broadcast %cst_15 : f32 to vector<64x1024xf32>
    %40 = arith.maximumf %38, %39 : vector<64x1024xf32>
    %c0_16 = arith.constant 0 : index
    %c0_17 = arith.constant 0 : index
    %c0_18 = arith.constant 0 : index
    %41 = vector.load %arg5[%c0_16, %c0_17, %c0_18] : memref<1x2x64xbf16, #tpu.memory_space<vmem>>, vector<1x2x64xbf16>
    %42 = vector.shape_cast %41 : vector<1x2x64xbf16> to vector<2x64xbf16>
    %43 = arith.truncf %40 : vector<64x1024xf32> to vector<64x1024xbf16>
    %cst_19 = arith.constant dense<0.000000e+00> : vector<2x1024xf32>
    %44 = tpu.matmul %42, %43, %cst_19 {dimension_numbers = #tpu.dot_dimension_numbers<[1], [0], [0], [1], [0, 0, 1, 1], [], []>} : vector<2x64xbf16>, vector<64x1024xbf16>, vector<2x1024xf32> -> vector<2x1024xf32>
    %45 = vector.broadcast %10 : vector<2x1xf32> to vector<2x1024xf32>
    %46 = arith.addf %44, %45 : vector<2x1024xf32>
    %c0_20 = arith.constant 0 : index
    %c0_21 = arith.constant 0 : index
    %c0_22 = arith.constant 0 : index
    %47 = vector.load %arg7[%c0_20, %c0_21, %c0_22] : memref<1x2x1024xf32, #tpu.memory_space<vmem>>, vector<1x2x1024xf32>
    %48 = vector.shape_cast %47 : vector<1x2x1024xf32> to vector<2x1024xf32>
    %49 = vector.shape_cast %46 : vector<2x1024xf32> to vector<1x2x1024xf32>
    tpu.vector_store %arg7[%c0_20, %c0_21, %c0_22], %49 {strides = array<i32>} : memref<1x2x1024xf32, #tpu.memory_space<vmem>>, vector<1x2x1024xf32>,
    return
  }
  func.func @transform_0(%arg0: i32, %arg1: i32) -> (i32, i32, i32, i32) {
    %c0_i32 = arith.constant 0 : i32
    %c0_i32_0 = arith.constant 0 : i32
    %c0_i32_1 = arith.constant 0 : i32
    return %arg0, %c0_i32, %c0_i32_0, %arg1 : i32, i32, i32, i32
  }
  func.func @transform_1(%arg0: i32, %arg1: i32) -> (i32, i32, i32, i32) {
    %c0_i32 = arith.constant 0 : i32
    %c0_i32_0 = arith.constant 0 : i32
    %c0_i32_1 = arith.constant 0 : i32
    %c0_i32_2 = arith.constant 0 : i32
    return %arg0, %c0_i32, %c0_i32_0, %c0_i32_1 : i32, i32, i32, i32
  }
  func.func @transform_2(%arg0: i32, %arg1: i32) -> (i32, i32, i32) {
    %c0_i32 = arith.constant 0 : i32
    %c0_i32_0 = arith.constant 0 : i32
    %c0_i32_1 = arith.constant 0 : i32
    return %arg0, %c0_i32, %c0_i32_0 : i32, i32, i32
  }
  func.func @transform_3(%arg0: i32, %arg1: i32) -> (i32, i32, i32) {
    %c0_i32 = arith.constant 0 : i32
    %c0_i32_0 = arith.constant 0 : i32
    %c0_i32_1 = arith.constant 0 : i32
    return %arg0, %c0_i32, %c0_i32_0 : i32, i32, i32
  }
  func.func @transform_4(%arg0: i32, %arg1: i32) -> (i32, i32, i32, i32) {
    %c0_i32 = arith.constant 0 : i32
    %c0_i32_0 = arith.constant 0 : i32
    %c0_i32_1 = arith.constant 0 : i32
    %c0_i32_2 = arith.constant 0 : i32
    return %arg0, %c0_i32, %c0_i32_0, %c0_i32_1 : i32, i32, i32, i32
  }
  func.func @transform_5(%arg0: i32, %arg1: i32) -> (i32, i32, i32) {
    %c0_i32 = arith.constant 0 : i32
    %c0_i32_0 = arith.constant 0 : i32
    return %arg0, %c0_i32, %arg1 : i32, i32, i32
  }
}

</mosaic_0001>

<bundles_post_ra>
// kernel: meta_sdf_forward.1
= control target key start
LH: loop header
LB: loop body
LE: loop exit
PB: predicated region body
PF: predicated region fallthrough
CT: control target
= control target key end

     0   :  { %10 = vsyncpa [#allocation3], 0  ;;  %s3272_s0 = inlined_call_operand.hbm [shape: f32[1,2,3,1024], index: 0, kind: input, shape index: {}]   ;;  %s3273_s1 = inlined_call_operand.hbm [shape: f32[1,2,32,3], index: 1, kind: input, shape index: {}]   ;;  %s3274_s2 = inlined_call_operand.hbm [shape: bf16[1,64,64], index: 2, kind: input, shape index: {}]   ;;  %s3275_s3 = inlined_call_operand.hbm [shape: bf16[1,2,64], index: 3, kind: input, shape index: {}]   ;;  %s3276_s4 = inlined_call_operand.hbm [shape: f32[1,2,32,3], index: 4, kind: input, shape index: {}]   ;;  %s3277_s5 = inlined_call_operand.hbm [shape: f32[1,2,1024], index: 5, kind: output, shape index: {}]  }
   0x1   :  { %11 = vsyncpa [#allocation6], 0 }
   0x2   :  { %12 = vsyncpa [#allocation9], 0 }
   0x3   :  { %13 = vsyncpa [#allocation4], 0  ;;  %s2084_s18 = smov [#allocation5]   ;;  %s1944_s22 = scalar_lea.hbm %s3273_s1, 1024 }
   0x4   :  { %s31_s19 = sshll.u32 %s2084_s18, 4  ;;  %p1945_p0 = scmp.ne.s32.totalorder %s3273_s1, %s1944_s22  ;;  %s32_s19 = int_to_ptr.vmem [resolvable:$true] %s31_s19 }
   0x5   :  { %p1948_p1 = scmp.lt.u32.totalorder %s1944_s22, %s3273_s1 }
   0x7   :  { %p1950_p2 = pnand %p1948_p1, %p1945_p0 }
   0x9   :  { %1953 = shalt.err (!%p1950_p2)
}
   0xa   :  { %s1954_s27 = scalar_lea.vmem %s32_s19, 1024  ;;  %p1959_p4 = scmp.lt.s32.totalorder %s32_s19, %s32_s19 }
   0xb   :  { %p1955_p3 = scmp.ne.s32.totalorder %s32_s19, %s1954_s27  ;;  %p1960_p5 = scmp.lt.s32.totalorder %s1954_s27, %s1954_s27 }
   0xd   :  { %p1961_p6 = por %p1960_p5, %p1959_p4 }
   0xf   :  { %p1962_p7 = pnand %p1961_p6, %p1955_p3 }
  0x11   :  { %1965 = shalt.err (!%p1962_p7)
}
  0x12   :  { %s2085_s28 = smov 128   ;;  %s2086_s29 = smov 8  }
  0x13   :  { %37 = dma.hbm_to_vmem [thread:$0]  %s3273_s1, 1024, %s32_s19, [#allocation6], %s2085_s28, %s2085_s28, %s2086_s29  }
  0x14   :  { %s2087_s7 = smov [#allocation8]   ;;  %s2088_s9 = smov [#allocation2]  }
  0x15   :  { %s56_s8 = sshll.u32 %s2087_s7, 4  ;;  %s19_s10 = sshll.u32 %s2088_s9, 4  ;;  %s57_s8 = int_to_ptr.vmem [resolvable:$true] %s56_s8  ;;  %s20_s10 = int_to_ptr.vmem [resolvable:$true] %s19_s10 }
  0x16   :  { %s1966_s13 = scalar_lea.hbm %s3275_s3, 16 }
  0x17   :  { %p1967_p8 = scmp.ne.s32.totalorder %s3275_s3, %s1966_s13  ;;  %p1970_p9 = scmp.lt.u32.totalorder %s1966_s13, %s3275_s3 }
  0x19   :  { %p1972_p10 = pnand %p1970_p9, %p1967_p8 }
  0x1b   :  { %1975 = shalt.err (!%p1972_p10)
}
  0x1c   :  { %s1976_s1 = scalar_lea.vmem %s57_s8, 16  ;;  %s1980_s18 = scalar_lea.vmem %s57_s8, 32 }
  0x1d   :  { %p1977_p11 = scmp.ne.s32.totalorder %s57_s8, %s1976_s1  ;;  %p1981_p12 = scmp.lt.s32.totalorder %s57_s8, %s57_s8 }
  0x1e   :  { %p1982_p13 = scmp.lt.s32.totalorder %s1980_s18, %s1976_s1 }
  0x20   :  { %p1983_p0 = por %p1982_p13, %p1981_p12 }
  0x22   :  { %p1984_p1 = pnand %p1983_p0, %p1977_p11 }
  0x24   :  { %1987 = shalt.err (!%p1984_p1)
}
  0x25   :  { %59 = dma.hbm_to_vmem [thread:$0]  %s3275_s3, 16, %s57_s8, [#allocation9]  }
  0x26   :  { %s1988_s23 = scalar_lea.hbm %s3272_s0, 1024 }
  0x27   :  { %p1989_p2 = scmp.ne.s32.totalorder %s3272_s0, %s1988_s23  ;;  %p1992_p3 = scmp.lt.u32.totalorder %s1988_s23, %s3272_s0 }
  0x29   :  { %p1994_p4 = pnand %p1992_p3, %p1989_p2 }
  0x2b   :  { %1997 = shalt.err (!%p1994_p4)
}
  0x2c   :  { %s1998_s30 = scalar_lea.vmem %s20_s10, 1024  ;;  %p2003_p6 = scmp.lt.s32.totalorder %s20_s10, %s20_s10 }
  0x2d   :  { %p1999_p5 = scmp.ne.s32.totalorder %s20_s10, %s1998_s30  ;;  %p2004_p7 = scmp.lt.s32.totalorder %s1998_s30, %s1998_s30 }
  0x2f   :  { %p2005_p8 = por %p2004_p7, %p2003_p6 }
  0x31   :  { %p2006_p9 = pnand %p2005_p8, %p1999_p5 }
  0x33   :  { %2009 = shalt.err (!%p2006_p9)
}
  0x34   :  { %s2089_s3 = smov 512   ;;  %s2090_s6 = smov 32  }
  0x35   :  { %25 = dma.hbm_to_vmem [thread:$0]  %s3272_s0, 1024, %s20_s10, [#allocation3], %s2089_s3, %s2089_s3, %s2090_s6  }
  0x36   :  { %s2091_s9 = smov [#allocation7]   ;;  %s2010_s14 = scalar_lea.hbm %s3274_s2, 512 }
  0x37   :  { %s43_s11 = sshll.u32 %s2091_s9, 4  ;;  %p2011_p10 = scmp.ne.s32.totalorder %s3274_s2, %s2010_s14  ;;  %s44_s11 = int_to_ptr.vmem [resolvable:$true] %s43_s11 }
  0x38   :  { %p2014_p11 = scmp.lt.u32.totalorder %s2010_s14, %s3274_s2 }
  0x3a   :  { %p2016_p12 = pnand %p2014_p11, %p2011_p10 }
  0x3c   :  { %2019 = shalt.err (!%p2016_p12)
}
  0x3d   :  { %s2020_s18 = scalar_lea.vmem %s44_s11, 512  ;;  %p2025_p0 = scmp.lt.s32.totalorder %s44_s11, %s44_s11 }
  0x3e   :  { %p2021_p13 = scmp.ne.s32.totalorder %s44_s11, %s2020_s18  ;;  %p2026_p1 = scmp.lt.s32.totalorder %s2020_s18, %s2020_s18 }
  0x40   :  { %p2027_p2 = por %p2026_p1, %p2025_p0 }
  0x42   :  { %p2028_p3 = pnand %p2027_p2, %p2021_p13 }
  0x44   :  { %2031 = shalt.err (!%p2028_p3)
}
  0x45   :  { %s2092_s0 = smov 64   ;;  %s2093_s10 = smov 4  }
  0x46   :  { %49 = dma.hbm_to_vmem [thread:$0]  %s3274_s2, 512, %s44_s11, [#allocation6], %s2092_s0, %s2092_s0, %s2093_s10  }
  0x47   :  { %s2094_s21 = smov [#allocation10]   ;;  %s2032_s25 = scalar_lea.hbm %s3276_s4, 1024 }
  0x48   :  { %s65_s22 = sshll.u32 %s2094_s21, 4  ;;  %p2033_p4 = scmp.ne.s32.totalorder %s3276_s4, %s2032_s25  ;;  %s66_s22 = int_to_ptr.vmem [resolvable:$true] %s65_s22 }
  0x49   :  { %p2036_p5 = scmp.lt.u32.totalorder %s2032_s25, %s3276_s4 }
  0x4b   :  { %p2038_p6 = pnand %p2036_p5, %p2033_p4 }
  0x4d   :  { %2041 = shalt.err (!%p2038_p6)
}
  0x4e   :  { %s2042_s6 = scalar_lea.vmem %s66_s22, 1024  ;;  %p2047_p8 = scmp.lt.s32.totalorder %s66_s22, %s66_s22 }
  0x4f   :  { %p2043_p7 = scmp.ne.s32.totalorder %s66_s22, %s2042_s6  ;;  %p2048_p9 = scmp.lt.s32.totalorder %s2042_s6, %s2042_s6 }
  0x51   :  { %p2049_p10 = por %p2048_p9, %p2047_p8 }
  0x53   :  { %p2050_p11 = pnand %p2049_p10, %p2043_p7 }
  0x55   :  { %2053 = shalt.err (!%p2050_p11)
}
  0x56   :  { %71 = dma.hbm_to_vmem [thread:$0]  %s3276_s4, 1024, %s66_s22, [#allocation9], %s2085_s28, %s2085_s28, %s2086_s29  }
  0x57   :  { %2076 = dma.done.wait [#allocation3], 1024  }
  0x58   :  { %2077 = vsyncadd [#allocation3], 4294966272 }
  0x59   :  { %2078 = dma.done.wait [#allocation6], 1536  }
  0x5a   :  { %2079 = vsyncadd [#allocation6], 4294965760 }
  0x5b   :  { %2080 = dma.done.wait [#allocation9], 1040  }
  0x5c   :  { %2081 = vsyncadd [#allocation9], 4294966256  ;;  %v3278_v0 = vmov 0   ;;  %v2200_v1 = vld [vmem:[#allocation10] sm:$0xff]  ;;  %v2203_v3 = vld [vmem:[#allocation10 + $0x8] sm:$0xff]  ;;  %v2096_v6 = vmov 1   ;;  %v160_v19 = vlaneseq }
  0x5d   :  { %1919 = vset.pattern.permute.xlu1 %v3278_v0  ;;  %1918 = vset.pattern.permute.xlu0 %v3278_v0  ;;  %v96_v2 = vld [vmem:[#allocation5] sm:$0xff]  ;;  %v97_v4 = vld [vmem:[#allocation5 + $0x8] sm:$0xff]  ;;  %v99_v5 = vld [vmem:[#allocation5 + $0x18] sm:$0xff]  ;;  %v2097_v11 = vmov 2   ;;  %vm1236_vm0 = vcmask 523264   ;;  %vm1645_vm1 = vcmask 1041409  }
  0x5e   :  { %1281 = vmatprep.mubr.bf16.mxu0 %v3278_v0  ;;  %1354 = vmatprep.mubr.bf16.mxu1 %v3278_v0  ;;  %v106_v7 = vld [vmem:[#allocation10 + $0x10] sm:$0xff]  ;;  %v101_v9 = vld [vmem:[#allocation5 + $0x28] sm:$0xff]  ;;  %v107_v13 = vld [vmem:[#allocation10 + $0x18] sm:$0xff]  ;;  %v2227_v20 = vshrl.u32 %v160_v19, 7  ;;  %s2099_s4 = smov [#allocation11]  }
  0x5f   :  { %370 = vperm.xlu1 %1919, %v2200_v1   ;;  %114 = vperm.xlu0 %1918, %v96_v2   ;;  %v98_v8 = vld [vmem:[#allocation5 + $0x10] sm:$0xff]  ;;  %v2207_v10 = vld [vmem:[#allocation10 + $0x20] sm:$0xff]  ;;  %v103_v12 = vld [vmem:[#allocation5 + $0x38] sm:$0xff]  ;;  %s1867_s28 = sshll.u32 %s2099_s4, 4  ;;  %s1868_s28 = int_to_ptr.vmem [resolvable:$true] %s1867_s28 }
  0x60   :  { %v2211_v14 = vld [vmem:[#allocation10 + $0x30] sm:$0xff]  ;;  %v100_v15 = vld [vmem:[#allocation5 + $0x20] sm:$0xff]  ;;  %v109_v17 = vld [vmem:[#allocation10 + $0x28] sm:$0xff]  ;;  %3335 = vst [vmem:[#allocation16_spill] sm:$0xff] %v2227_v20  ;;  %v2230_v21 = vsub.s32 4, %v2227_v20  ;;  %v2233_v22 = vsub.s32 5, %v2227_v20  ;;  %p2059_p13 = scmp.lt.s32.totalorder %s1868_s28, %s1868_s28 }
  0x61   :  { %v102_v16 = vld [vmem:[#allocation5 + $0x30] sm:$0xff]  ;;  %v111_v18 = vld [vmem:[#allocation10 + $0x38] sm:$0xff]  ;;  %v2236_v24 = vsub.s32 0, %v2227_v20  ;;  %v2239_v25 = vsub.s32 1, %v2227_v20  ;;  %v89_v26 = vld [vmem:[#allocation2 + $0x8] sm:$0x77] }
  0x62   :  { %v88_v23 = vld [vmem:[#allocation2] sm:$0x77]  ;;  %v2242_v27 = vsub.s32 6, %v2227_v20  ;;  %v2246_v28 = vsub.s32 2, %v2227_v20  ;;  %v2248_v29 = vld [vmem:[#allocation2 + $0x10] sm:$0x77]  ;;  %v175_v32 = vrot.slane %v89_v26, %v2230_v21  ;;  %v519_v33 = vrot.slane %v89_v26, %v2233_v22 }
  0x63   :  { %375 = vperm.xlu1 %1919, %v2203_v3   ;;  %119 = vperm.xlu0 %1918, %v97_v4   ;;  %v167_v30 = vrot.slane %v88_v23, %v2230_v21  ;;  %v511_v31 = vrot.slane %v88_v23, %v2233_v22  ;;  %v163_v34 = vrot.slane %v88_v23, %v2236_v24  ;;  %v2276_v46 = vld [vmem:[#allocation2 + $0x18] sm:$0x77]  ;;  %v2294_v53 = vld [vmem:[#allocation2 + $0x20] sm:$0x77]  ;;  %v2296_v54 = vld [vmem:[#allocation2 + $0x28] sm:$0x77] }
  0x64   :  { %v507_v35 = vrot.slane %v88_v23, %v2239_v25  ;;  %v171_v36 = vrot.slane %v89_v26, %v2236_v24  ;;  %v515_v37 = vrot.slane %v89_v26, %v2239_v25  ;;  %v815_v38 = vrot.slane %v88_v23, %v2242_v27  ;;  %s2054_s29 = scalar_lea.vmem %s1868_s28, 256 }
  0x65   :  { %v183_v39 = vrot.slane %v2248_v29, %v2230_v21  ;;  %v823_v40 = vrot.slane %v89_v26, %v2242_v27  ;;  %v811_v41 = vrot.slane %v88_v23, %v2246_v28  ;;  %v2265_v42 = vrot.slane %v167_v30, %v2236_v24  ;;  %p2055_p12 = scmp.ne.s32.totalorder %s1868_s28, %s2054_s29  ;;  %p2060_p0 = scmp.lt.s32.totalorder %s2054_s29, %s2054_s29 }
  0x66   :  { %v2268_v43 = vrot.slane %v511_v31, %v2239_v25  ;;  %v2271_v44 = vrot.slane %v175_v32, %v2236_v24  ;;  %v2274_v45 = vrot.slane %v519_v33, %v2239_v25  ;;  %v2279_v47 = vrot.slane %v163_v34, %v2236_v24  ;;  %v2385_v34 = vld [vmem:[#allocation2 + $0x30] sm:$0x77] }
  0x67   :  { %1920 = vset.pattern.permute.xlu1 %v2096_v6  ;;  %129 = vperm.xlu0 %1918, %v99_v5   ;;  %v2282_v48 = vrot.slane %v507_v35, %v2239_v25  ;;  %v2285_v49 = vrot.slane %v171_v36, %v2236_v24  ;;  %v2288_v50 = vrot.slane %v515_v37, %v2239_v25  ;;  %v2387_v35 = vld [vmem:[#allocation2 + $0x38] sm:$0x77]  ;;  %p2061_p1 = por %p2060_p0, %p2059_p13 }
  0x68   :  { %477 = vperm.xlu1 %1920, %v97_v4   ;;  %v2291_v51 = vrot.slane %v815_v38, %v2246_v28  ;;  %v819_v52 = vrot.slane %v89_v26, %v2246_v28  ;;  %v2299_v55 = vrot.slane %v183_v39, %v2236_v24  ;;  %v527_v56 = vrot.slane %v2248_v29, %v2233_v22 }
  0x69   :  { %v2305_v57 = vrot.slane %v823_v40, %v2246_v28  ;;  %v2308_v58 = vrot.slane %v811_v41, %v2246_v28  ;;  %v191_v59 = vrot.slane %v2276_v46, %v2230_v21  ;;  %v179_v60 = vrot.slane %v2248_v29, %v2236_v24  ;;  %p2062_p2 = pnand %p2061_p1, %p2055_p12 }
  0x6a   :  { %v535_v61 = vrot.slane %v2276_v46, %v2233_v22  ;;  %v523_v62 = vrot.slane %v2248_v29, %v2239_v25  ;;  %v187_v63 = vrot.slane %v2276_v46, %v2236_v24  ;;  %v827_v32 = vrot.slane %v2248_v29, %v2246_v28 }
  0x6b   :  { %380 = vperm.xlu0 %1918, %v106_v7   ;;  %v835_v33 = vrot.slane %v2276_v46, %v2246_v28  ;;  %v539_v36 = vrot.slane %v2294_v53, %v2239_v25  ;;  %v547_v38 = vrot.slane %v2296_v54, %v2239_v25  ;;  %v855_v40 = vrot.slane %v2296_v54, %v2242_v27 }
  0x6c   :  { %1921 = vset.pattern.permute.xlu1 %v3278_v0  ;;  %v843_v41 = vrot.slane %v2294_v53, %v2246_v28 }
  0x6d   :  { %124 = vperm.xlu1 %1921, %v98_v8  }
  0x6f   :  { %139 = vperm.xlu0 %1918, %v101_v9  }
  0x71   :  { %1922 = vset.pattern.permute.xlu1 %v2097_v11 }
  0x72   :  { %777 = vperm.xlu1 %1922, %v96_v2  }
  0x73   :  { %390 = vperm.xlu0 %1918, %v2207_v10  }
  0x76   :  { %781 = vperm.xlu1 %1922, %v97_v4   ;;  %v195_v4 = vrot.slane %v2294_v53, %v2236_v24 }
  0x77   :  { %149 = vperm.xlu0 %1918, %v103_v12  }
  0x78   :  { %v2370_v23 = vrot.slane %v195_v4, %v2236_v24  ;;  %v2442_v4 = vrot.slane %v843_v41, %v2246_v28 }
  0x7a   :  { %1923 = vset.pattern.permute.xlu1 %v3278_v0  ;;  %3349 = vst [vmem:[#allocation30_spill] sm:$0xff] %v2442_v4 }
  0x7b   :  { %385 = vperm.xlu1 %1923, %v107_v13   ;;  %400 = vperm.xlu0 %1918, %v2211_v14  }
  0x7f   :  { %1924 = vset.pattern.permute.xlu1 %v2096_v6  ;;  %1931 = vset.pattern.permute.xlu0 %v2096_v6 }
  0x80   :  { %485 = vperm.xlu1 %1924, %v99_v5   ;;  %473 = vperm.xlu0 %1931, %v96_v2   ;;  %v199_v2 = vrot.slane %v2294_v53, %v2230_v21 }
  0x84   :  { %1925 = vset.pattern.permute.xlu1 %v3278_v0  ;;  %481 = vperm.xlu0 %1931, %v98_v8  }
  0x85   :  { %134 = vperm.xlu1 %1925, %v100_v15  }
  0x88   :  { %489 = vperm.xlu0 %1931, %v100_v15  }
  0x89   :  { %1926 = vset.pattern.permute.xlu1 %v2097_v11 }
  0x8a   :  { %785 = vperm.xlu1 %1926, %v98_v8   ;;  %v551_v8 = vrot.slane %v2296_v54, %v2233_v22 }
  0x8c   :  { %497 = vperm.xlu0 %1931, %v102_v16   ;;  %v2379_v31 = vrot.slane %v551_v8, %v2239_v25 }
  0x8e   :  { %789 = vperm.xlu1 %1926, %v99_v5   ;;  %v831_v5 = vrot.slane %v2248_v29, %v2242_v27  ;;  %3341 = vst [vmem:[#allocation22_spill] sm:$0xff] %v2379_v31  ;;  %v847_v29 = vrot.slane %v2294_v53, %v2242_v27 }
  0x90   :  { %1935 = vset.pattern.permute.xlu0 %v2097_v11  ;;  %v2373_v26 = vrot.slane %v831_v5, %v2246_v28 }
  0x91   :  { %805 = vperm.xlu0 %1935, %v103_v12  }
  0x92   :  { %1927 = vset.pattern.permute.xlu1 %v3278_v0 }
  0x93   :  { %395 = vperm.xlu1 %1927, %v109_v17  }
  0x95   :  { %1937 = vset.pattern.permute.xlu0 %v2096_v6 }
  0x96   :  { %1193 = vperm.xlu0 %1937, %v106_v7   ;;  %v543_v7 = vrot.slane %v2294_v53, %v2233_v22  ;;  %v567_v53 = vrot.slane %v2387_v35, %v2233_v22 }
  0x97   :  { %1928 = vset.pattern.permute.xlu1 %v2096_v6 }
  0x98   :  { %493 = vperm.xlu1 %1928, %v101_v9   ;;  %v2376_v30 = vrot.slane %v543_v7, %v2239_v25 }
  0x9a   :  { %1205 = vperm.xlu0 %1937, %v109_v17   ;;  %3340 = vst [vmem:[#allocation21_spill] sm:$0xff] %v2376_v30 }
  0x9c   :  { %1929 = vset.pattern.permute.xlu1 %v3278_v0 }
  0x9d   :  { %144 = vperm.xlu1 %1929, %v102_v16  }
  0x9e   :  { %1213 = vperm.xlu0 %1937, %v111_v18  }
  0xa1   :  { %1930 = vset.pattern.permute.xlu1 %v2097_v11 }
  0xa2   :  { %793 = vperm.xlu1 %1930, %v100_v15   ;;  %1939 = vset.pattern.permute.xlu0 %v2097_v11  ;;  %v2355_v15 = vrot.slane %v523_v62, %v2239_v25  ;;  %v219_v62 = vrot.slane %v2387_v35, %v2236_v24 }
  0xa3   :  { %1639 = vperm.xlu0 %1939, %v2200_v1  }
  0xa4   :  { %3338 = vst [vmem:[#allocation19_spill] sm:$0xff] %v2355_v15 }
  0xa6   :  { %797 = vperm.xlu1 %1930, %v101_v9   ;;  %v2339_v9 = vrot.slane %v527_v56, %v2239_v25  ;;  %v559_v56 = vrot.slane %v2385_v34, %v2233_v22  ;;  %v2436_v22 = vrot.slane %v847_v29, %v2246_v28  ;;  %v2466_v29 = vrot.slane %v219_v62, %v2236_v24 }
  0xa8   :  { %3336 = vst [vmem:[#allocation17_spill] sm:$0xff] %v2339_v9  ;;  %3347 = vst [vmem:[#allocation28_spill] sm:$0xff] %v2436_v22  ;;  %v2451_v8 = vrot.slane %v559_v56, %v2239_v25  ;;  %v867_v56 = vrot.slane %v2387_v35, %v2246_v28 }
  0xa9   :  { %3357 = vst [vmem:[#allocation38_spill] sm:$0xff] %v2466_v29 }
  0xaa   :  { %1932 = vset.pattern.permute.xlu1 %v3278_v0  ;;  %3352 = vst [vmem:[#allocation33_spill] sm:$0xff] %v2451_v8 }
  0xab   :  { %405 = vperm.xlu1 %1932, %v111_v18   ;;  %v2364_v18 = vrot.slane %v199_v2, %v2236_v24  ;;  %v863_v2 = vrot.slane %v2385_v34, %v2242_v27 }
  0xad   :  { %v2471_v41 = vrot.slane %v863_v2, %v2246_v28 }
  0xaf   :  { %1933 = vset.pattern.permute.xlu1 %v2096_v6  ;;  %3358 = vst [vmem:[#allocation39_spill] sm:$0xff] %v2471_v41 }
  0xb0   :  { %501 = vperm.xlu1 %1933, %v103_v12   ;;  %v839_v12 = vrot.slane %v2276_v46, %v2242_v27 }
  0xb2   :  { %v2397_v39 = vrot.slane %v839_v12, %v2246_v28 }
  0xb4   :  { %1934 = vset.pattern.permute.xlu1 %v2097_v11  ;;  %3342 = vst [vmem:[#allocation23_spill] sm:$0xff] %v2397_v39 }
  0xb5   :  { %801 = vperm.xlu1 %1934, %v102_v16   ;;  %v2358_v16 = vrot.slane %v187_v63, %v2236_v24  ;;  %v2425_v63 = vrot.slane %v539_v36, %v2239_v25  ;;  %v2460_v36 = vrot.slane %v567_v53, %v2239_v25 }
  0xb7   :  { %3344 = vst [vmem:[#allocation25_spill] sm:$0xff] %v2425_v63  ;;  %3355 = vst [vmem:[#allocation36_spill] sm:$0xff] %v2460_v36 }
  0xb9   :  { %1936 = vset.pattern.permute.xlu1 %v2096_v6  ;;  %v2332_v6 = vrot.slane %v819_v52, %v2246_v28  ;;  %v215_v52 = vrot.slane %v2385_v34, %v2230_v21 }
  0xba   :  { %1185 = vperm.xlu1 %1936, %v2200_v1   ;;  %v531_v1 = vrot.slane %v2276_v46, %v2239_v25  ;;  %v851_v46 = vrot.slane %v2296_v54, %v2246_v28 }
  0xbb   :  { %v2448_v7 = vrot.slane %v215_v52, %v2236_v24  ;;  %v859_v52 = vrot.slane %v2385_v34, %v2246_v28 }
  0xbc   :  { %v2361_v17 = vrot.slane %v531_v1, %v2239_v25  ;;  %v2431_v1 = vrot.slane %v835_v33, %v2246_v28  ;;  %v2445_v5 = vrot.slane %v851_v46, %v2246_v28  ;;  %v871_v46 = vrot.slane %v2387_v35, %v2242_v27 }
  0xbd   :  { %3351 = vst [vmem:[#allocation32_spill] sm:$0xff] %v2448_v7 }
  0xbe   :  { %1189 = vperm.xlu1 %1936, %v2203_v3   ;;  %v207_v3 = vrot.slane %v2296_v54, %v2230_v21  ;;  %3339 = vst [vmem:[#allocation20_spill] sm:$0xff] %v2361_v17  ;;  %3346 = vst [vmem:[#allocation27_spill] sm:$0xff] %v2431_v1 }
  0xbf   :  { %3350 = vst [vmem:[#allocation31_spill] sm:$0xff] %v2445_v5 }
  0xc0   :  { %v2367_v19 = vrot.slane %v207_v3, %v2236_v24  ;;  %v2439_v3 = vrot.slane %v855_v40, %v2246_v28  ;;  %v563_v40 = vrot.slane %v2387_v35, %v2239_v25 }
  0xc2   :  { %1197 = vperm.xlu1 %1936, %v107_v13   ;;  %v2349_v13 = vrot.slane %v179_v60, %v2236_v24  ;;  %v211_v60 = vrot.slane %v2385_v34, %v2236_v24  ;;  %3348 = vst [vmem:[#allocation29_spill] sm:$0xff] %v2439_v3 }
  0xc4   :  { %v2457_v12 = vrot.slane %v211_v60, %v2236_v24 }
  0xc6   :  { %1201 = vperm.xlu1 %1936, %v2207_v10   ;;  %3354 = vst [vmem:[#allocation35_spill] sm:$0xff] %v2457_v12 }
  0xca   :  { %1209 = vperm.xlu1 %1936, %v2211_v14   ;;  %v2352_v14 = vrot.slane %v535_v61, %v2239_v25  ;;  %v2416_v61 = vrot.slane %v827_v32, %v2246_v28 }
  0xcc   :  { %3337 = vst [vmem:[#allocation18_spill] sm:$0xff] %v2352_v14  ;;  %3343 = vst [vmem:[#allocation24_spill] sm:$0xff] %v2416_v61 }
  0xce   :  { %1938 = vset.pattern.permute.xlu1 %v2097_v11  ;;  %v2344_v11 = vrot.slane %v191_v59, %v2236_v24  ;;  %v223_v59 = vrot.slane %v2387_v35, %v2230_v21  ;;  %v2428_v21 = vrot.slane %v547_v38, %v2239_v25 }
  0xcf   :  { %1642 = vperm.xlu1 %1938, %v2207_v10   ;;  %v203_v10 = vrot.slane %v2296_v54, %v2236_v24  ;;  %v555_v54 = vrot.slane %v2385_v34, %v2239_v25 }
  0xd0   :  { %3345 = vst [vmem:[#allocation26_spill] sm:$0xff] %v2428_v21 }
  0xd1   :  { %v2392_v37 = vrot.slane %v203_v10, %v2236_v24  ;;  %v2454_v10 = vrot.slane %v223_v59, %v2236_v24  ;;  %v2463_v38 = vrot.slane %v555_v54, %v2239_v25 }
  0xd3   :  { %3353 = vst [vmem:[#allocation34_spill] sm:$0xff] %v2454_v10  ;;  %3356 = vst [vmem:[#allocation37_spill] sm:$0xff] %v2463_v38 }
  0xde   :  { %v371_v32 = vpop.permute.xlu1 %370  ;;  %v115_v33 = vpop.permute.xlu0 %114 }
  0xdf   :  { %v309_v59 = vmul.f32 %v2299_v55, %v115_v33  ;;  %v311_v24 = vmul.f32 %v2344_v11, %v115_v33  ;;  %v308_v60 = vmul.f32 %v2349_v13, %v115_v33  ;;  %v310_v53 = vmul.f32 %v2358_v16, %v115_v33 }
  0xe0   :  { %v305_v54 = vmul.f32 %v2265_v42, %v115_v33  ;;  %v307_v62 = vmul.f32 %v2271_v44, %v115_v33  ;;  %v304_v27 = vmul.f32 %v2279_v47, %v115_v33  ;;  %v306_v2 = vmul.f32 %v2285_v49, %v115_v33 }
  0xe1   :  { %v2487_v20 = vadd.f32 %v371_v32, %v309_v59  ;;  %v2489_v35 = vadd.f32 %v371_v32, %v311_v24  ;;  %v2491_v38 = vadd.f32 %v371_v32, %v308_v60  ;;  %v2493_v36 = vadd.f32 %v371_v32, %v310_v53 }
  0xe2   :  { %v376_v34 = vpop.permute.xlu1 %375  ;;  %v120_v0 = vpop.permute.xlu0 %119  ;;  %v2504_v60 = vrot.slane %v871_v46, %v2246_v28  ;;  %v2507_v53 = vrot.slane %v859_v52, %v2246_v28  ;;  %v2515_v30 = vadd.f32 %v371_v32, %v305_v54  ;;  %v2519_v46 = vadd.f32 %v371_v32, %v304_v27 }
  0xe3   :  { %3359 = vst [vmem:[#allocation40_spill] sm:$0xff] %v2487_v20  ;;  %3360 = vst [vmem:[#allocation41_spill] sm:$0xff] %v2489_v35  ;;  %v313_v41 = vmul.f32 %v2265_v42, %v120_v0  ;;  %v315_v8 = vmul.f32 %v2271_v44, %v120_v0  ;;  %v312_v5 = vmul.f32 %v2279_v47, %v120_v0 }
  0xe4   :  { %3361 = vst [vmem:[#allocation42_spill] sm:$0xff] %v2491_v38  ;;  %3362 = vst [vmem:[#allocation43_spill] sm:$0xff] %v2493_v36  ;;  %v314_v4 = vmul.f32 %v2285_v49, %v120_v0  ;;  %v317_v33 = vmul.f32 %v2299_v55, %v120_v0  ;;  %v319_v3 = vmul.f32 %v2344_v11, %v120_v0 }
  0xe5   :  { %v316_v59 = vmul.f32 %v2349_v13, %v120_v0  ;;  %v318_v24 = vmul.f32 %v2358_v16, %v120_v0  ;;  %3363 = vst [vmem:[#allocation44_spill] sm:$0xff] %v2504_v60  ;;  %3364 = vst [vmem:[#allocation45_spill] sm:$0xff] %v2507_v53  ;;  %v2510_v36 = vrot.slane %v563_v40, %v2239_v25 }
  0xe6   :  { %v2513_v38 = vrot.slane %v867_v56, %v2246_v28  ;;  %v130_v35 = vpop.permute.xlu0 %129  ;;  %v421_v20 = vadd.f32 %v376_v34, %v317_v33  ;;  %v423_v22 = vadd.f32 %v376_v34, %v319_v3  ;;  %3367 = vst [vmem:[#allocation48_spill] sm:$0xff] %v2515_v30  ;;  %v2517_v0 = vadd.f32 %v371_v32, %v307_v62 }
  0xe7   :  { %3365 = vst [vmem:[#allocation46_spill] sm:$0xff] %v2510_v36  ;;  %v420_v21 = vadd.f32 %v376_v34, %v316_v59  ;;  %v422_v63 = vadd.f32 %v376_v34, %v318_v24  ;;  %v478_v31 = vpop.permute.xlu1 %477  ;;  %3369 = vst [vmem:[#allocation50_spill] sm:$0xff] %v2519_v46  ;;  %v2521_v52 = vadd.f32 %v371_v32, %v306_v2 }
  0xe8   :  { %3366 = vst [vmem:[#allocation47_spill] sm:$0xff] %v2513_v38  ;;  %3368 = vst [vmem:[#allocation49_spill] sm:$0xff] %v2517_v0  ;;  %v417_v53 = vadd.f32 %v376_v34, %v313_v41  ;;  %v419_v25 = vadd.f32 %v376_v34, %v315_v8  ;;  %v416_v40 = vadd.f32 %v376_v34, %v312_v5 }
  0xe9   :  { %3370 = vst [vmem:[#allocation51_spill] sm:$0xff] %v2521_v52  ;;  %v418_v36 = vadd.f32 %v376_v34, %v314_v4  ;;  %v661_v28 = vmul.f32 %v2339_v9, %v478_v31  ;;  %v663_v56 = vmul.f32 %v2352_v14, %v478_v31  ;;  %v660_v3 = vmul.f32 %v2355_v15, %v478_v31 }
  0xea   :  { %v662_v33 = vmul.f32 %v2361_v17, %v478_v31  ;;  %v381_v54 = vpop.permute.xlu0 %380  ;;  %v657_v62 = vmul.f32 %v2268_v43, %v478_v31  ;;  %v659_v27 = vmul.f32 %v2274_v45, %v478_v31  ;;  %v656_v32 = vmul.f32 %v2282_v48, %v478_v31 }
  0xeb   :  { %v658_v41 = vmul.f32 %v2288_v50, %v478_v31  ;;  %v2531_v8 = vadd.f32 %v661_v28, %v421_v20  ;;  %v2533_v4 = vadd.f32 %v663_v56, %v423_v22  ;;  %v2535_v5 = vadd.f32 %v660_v3, %v420_v21 }
  0xec   :  { %v2537_v2 = vadd.f32 %v662_v33, %v422_v63  ;;  %v125_v34 = vpop.permute.xlu1 %124  ;;  %v2540_v59 = vmul.f32 %v2265_v42, %v130_v35  ;;  %v2543_v24 = vmul.f32 %v2271_v44, %v130_v35  ;;  %v2546_v38 = vmul.f32 %v2279_v47, %v130_v35 }
  0xed   :  { %v2549_v31 = vmul.f32 %v2285_v49, %v130_v35  ;;  %v321_v20 = vmul.f32 %v2265_v42, %v125_v34  ;;  %v323_v21 = vmul.f32 %v2271_v44, %v125_v34  ;;  %v320_v63 = vmul.f32 %v2279_v47, %v125_v34 }
  0xee   :  { %v322_v22 = vmul.f32 %v2285_v49, %v125_v34  ;;  %v140_v28 = vpop.permute.xlu0 %139  ;;  %v325_v56 = vmul.f32 %v2299_v55, %v125_v34  ;;  %v327_v3 = vmul.f32 %v2344_v11, %v125_v34  ;;  %v324_v33 = vmul.f32 %v2349_v13, %v125_v34 }
  0xef   :  { %v326_v60 = vmul.f32 %v2358_v16, %v125_v34  ;;  %v721_v17 = vadd.f32 %v657_v62, %v417_v53  ;;  %v723_v15 = vadd.f32 %v659_v27, %v419_v25  ;;  %v720_v14 = vadd.f32 %v656_v32, %v416_v40 }
  0xf0   :  { %v722_v9 = vadd.f32 %v658_v41, %v418_v36  ;;  %v333_v42 = vmul.f32 %v2299_v55, %v130_v35  ;;  %v335_v44 = vmul.f32 %v2344_v11, %v130_v35  ;;  %v332_v47 = vmul.f32 %v2349_v13, %v130_v35 }
  0xf1   :  { %v334_v49 = vmul.f32 %v2358_v16, %v130_v35  ;;  %v778_v52 = vpop.permute.xlu1 %777  ;;  %v2563_v46 = vadd.f32 %v381_v54, %v325_v56  ;;  %v2565_v0 = vadd.f32 %v381_v54, %v327_v3  ;;  %v2567_v30 = vadd.f32 %v381_v54, %v324_v33 }
  0xf2   :  { %v2569_v34 = vadd.f32 %v381_v54, %v326_v60  ;;  %v2571_v53 = vpop.permute.xlu0 %390  ;;  %v2573_v36 = vadd.f32 %v381_v54, %v321_v20  ;;  %v2575_v55 = vadd.f32 %v381_v54, %v323_v21  ;;  %v2577_v11 = vadd.f32 %v381_v54, %v320_v63 }
  0xf3   :  { %3371 = vst [vmem:[#allocation52_spill] sm:$0xff] %v2563_v46  ;;  %3372 = vst [vmem:[#allocation53_spill] sm:$0xff] %v2565_v0  ;;  %v2579_v13 = vadd.f32 %v381_v54, %v322_v22  ;;  %v2582_v16 = vmul.f32 %v2364_v18, %v140_v28  ;;  %v2585_v35 = vmul.f32 %v2367_v19, %v140_v28 }
  0xf4   :  { %3373 = vst [vmem:[#allocation54_spill] sm:$0xff] %v2567_v30  ;;  %3374 = vst [vmem:[#allocation55_spill] sm:$0xff] %v2569_v34  ;;  %v2588_v25 = vmul.f32 %v2370_v23, %v140_v28  ;;  %v2591_v60 = vmul.f32 %v2392_v37, %v140_v28  ;;  %v2594_v40 = vmul.f32 %v2291_v51, %v778_v52 }
  0xf5   :  { %3375 = vst [vmem:[#allocation56_spill] sm:$0xff] %v2571_v53  ;;  %3376 = vst [vmem:[#allocation57_spill] sm:$0xff] %v2585_v35  ;;  %v2597_v62 = vmul.f32 %v2305_v57, %v778_v52  ;;  %v2600_v54 = vmul.f32 %v2308_v58, %v778_v52  ;;  %v2603_v27 = vmul.f32 %v2332_v6, %v778_v52  ;;  %v782_v32 = vpop.permute.xlu1 %781 }
  0xf6   :  { %3377 = vst [vmem:[#allocation58_spill] sm:$0xff] %v2588_v25  ;;  %3378 = vst [vmem:[#allocation59_spill] sm:$0xff] %v2591_v60  ;;  %v2606_v41 = vmul.f32 %v2373_v26, %v778_v52  ;;  %v2609_v20 = vmul.f32 %v2397_v39, %v778_v52  ;;  %v2612_v21 = vmul.f32 %v2416_v61, %v778_v52  ;;  %v150_v22 = vpop.permute.xlu0 %149 }
  0xf7   :  { %v2615_v63 = vmul.f32 %v2431_v1, %v778_v52  ;;  %v961_v56 = vmul.f32 %v2291_v51, %v782_v32  ;;  %v963_v3 = vmul.f32 %v2305_v57, %v782_v32  ;;  %v960_v33 = vmul.f32 %v2308_v58, %v782_v32 }
  0xf8   :  { %3379 = vst [vmem:[#allocation60_spill] sm:$0xff] %v2606_v41  ;;  %3380 = vst [vmem:[#allocation61_spill] sm:$0xff] %v2609_v20  ;;  %v962_v34 = vmul.f32 %v2332_v6, %v782_v32  ;;  %v2622_v30 = vmul.f32 %v2448_v7, %v140_v28  ;;  %v2625_v0 = vmul.f32 %v2454_v10, %v140_v28 }
  0xf9   :  { %3381 = vst [vmem:[#allocation62_spill] sm:$0xff] %v2612_v21  ;;  %3382 = vst [vmem:[#allocation63_spill] sm:$0xff] %v2615_v63  ;;  %v2628_v46 = vmul.f32 %v2457_v12, %v140_v28  ;;  %v2631_v52 = vmul.f32 %v2466_v29, %v140_v28  ;;  %v2633_v63 = vadd.f32 %v961_v56, %v721_v17 }
  0xfa   :  { %3383 = vst [vmem:[#allocation64_spill] sm:$0xff] %v2622_v30  ;;  %3384 = vst [vmem:[#allocation65_spill] sm:$0xff] %v2625_v0  ;;  %v2635_v21 = vadd.f32 %v963_v3, %v723_v15  ;;  %v2637_v20 = vadd.f32 %v960_v33, %v720_v14  ;;  %v2639_v41 = vadd.f32 %v962_v34, %v722_v9  ;;  %v2645_v35 = vpop.permute.xlu0 %400 }
  0xfb   :  { %3385 = vst [vmem:[#allocation66_spill] sm:$0xff] %v2628_v46  ;;  %3386 = vst [vmem:[#allocation67_spill] sm:$0xff] %v2631_v52  ;;  %v965_v60 = vmul.f32 %v2373_v26, %v782_v32  ;;  %v967_v30 = vmul.f32 %v2397_v39, %v782_v32  ;;  %v964_v0 = vmul.f32 %v2416_v61, %v782_v32  ;;  %v386_v46 = vpop.permute.xlu1 %385  ;;  %v1089_v28 = vmax.f32 %v2633_v63, 0.0 }
  0xfc   :  { %v966_v25 = vmul.f32 %v2431_v1, %v782_v32  ;;  %v2648_v17 = vmul.f32 %v2364_v18, %v150_v22  ;;  %v2651_v15 = vmul.f32 %v2367_v19, %v150_v22  ;;  %v2654_v9 = vmul.f32 %v2370_v23, %v150_v22 }
  0xfd   :  { %v2657_v14 = vmul.f32 %v2392_v37, %v150_v22  ;;  %v1091_v34 = vmax.f32 %v2635_v21, 0.0  ;;  %v1088_v32 = vmax.f32 %v2637_v20, 0.0  ;;  %v1090_v56 = vmax.f32 %v2639_v41, 0.0 }
  0xfe   :  { %3387 = vst [vmem:[#allocation68_spill] sm:$0xff] %v2651_v15  ;;  %3388 = vst [vmem:[#allocation69_spill] sm:$0xff] %v2654_v9  ;;  %v433_v3 = vadd.f32 %v386_v46, %v2540_v59  ;;  %v435_v33 = vadd.f32 %v386_v46, %v2543_v24  ;;  %v2666_v52 = vadd.f32 %v964_v0, %v2535_v5 }
  0xff   :  { %3389 = vst [vmem:[#allocation70_spill] sm:$0xff] %v2657_v14  ;;  %v2669_v1 = vadd.f32 %v966_v25, %v2537_v2  ;;  %v432_v61 = vadd.f32 %v386_v46, %v2546_v38  ;;  %v434_v63 = vadd.f32 %v386_v46, %v2549_v31  ;;  %v2674_v21 = vadd.f32 %v965_v60, %v2531_v8  ;;  %v2687_v5 = vpop.permute.xlu1 %485  ;;  %v2689_v2 = vpop.permute.xlu0 %473 }
 0x100   :  { %v2677_v20 = vadd.f32 %v967_v30, %v2533_v4  ;;  %v2679_v41 = vadd.f32 %v386_v46, %v333_v42  ;;  %v2681_v59 = vadd.f32 %v386_v46, %v335_v44  ;;  %v2683_v24 = vadd.f32 %v386_v46, %v332_v47 }
 0x101   :  { %v2685_v0 = vadd.f32 %v386_v46, %v334_v49  ;;  %v2692_v38 = vmul.f32 %v2448_v7, %v150_v22  ;;  %v2695_v8 = vmul.f32 %v2454_v10, %v150_v22  ;;  %v2698_v30 = vmul.f32 %v2457_v12, %v150_v22  ;;  %v3399_v12 = vld [vmem:[#allocation51_spill] sm:$0xff] }
 0x102   :  { %3390 = vst [vmem:[#allocation71_spill] sm:$0xff] %v2683_v24  ;;  %v2701_v4 = vmul.f32 %v2466_v29, %v150_v22  ;;  %v649_v46 = vmul.f32 %v2268_v43, %v2689_v2  ;;  %v651_v31 = vmul.f32 %v2274_v45, %v2689_v2  ;;  %v648_v42 = vmul.f32 %v2282_v48, %v2689_v2  ;;  %v3396_v22 = vld [vmem:[#allocation48_spill] sm:$0xff] }
 0x103   :  { %3391 = vst [vmem:[#allocation72_spill] sm:$0xff] %v2685_v0  ;;  %3392 = vst [vmem:[#allocation73_spill] sm:$0xff] %v2692_v38  ;;  %v650_v44 = vmul.f32 %v2288_v50, %v2689_v2  ;;  %v673_v47 = vmul.f32 %v2268_v43, %v2687_v5  ;;  %v675_v49 = vmul.f32 %v2274_v45, %v2687_v5  ;;  %v3398_v38 = vld [vmem:[#allocation50_spill] sm:$0xff]  ;;  %v2723_v7 = vpop.permute.xlu0 %481 }
 0x104   :  { %3393 = vst [vmem:[#allocation74_spill] sm:$0xff] %v2695_v8  ;;  %3394 = vst [vmem:[#allocation75_spill] sm:$0xff] %v2698_v30  ;;  %v672_v25 = vmul.f32 %v2282_v48, %v2687_v5  ;;  %v674_v60 = vmul.f32 %v2288_v50, %v2687_v5  ;;  %v3397_v30 = vld [vmem:[#allocation49_spill] sm:$0xff]  ;;  %v712_v29 = vadd.f32 %v648_v42, %v3398_v38  ;;  %v2729_v9 = vpop.permute.xlu1 %134 }
 0x105   :  { %3395 = vst [vmem:[#allocation76_spill] sm:$0xff] %v2701_v4  ;;  %v713_v4 = vadd.f32 %v649_v46, %v3396_v22  ;;  %v715_v8 = vadd.f32 %v651_v31, %v3397_v30  ;;  %v714_v10 = vadd.f32 %v650_v44, %v3399_v12  ;;  %v737_v0 = vadd.f32 %v673_v47, %v433_v3 }
 0x106   :  { %v739_v24 = vadd.f32 %v675_v49, %v435_v33  ;;  %v2725_v39 = vadd.f32 %v672_v25, %v432_v61  ;;  %v2727_v14 = vadd.f32 %v674_v60, %v434_v63  ;;  %3400 = vst [vmem:[#allocation48_spill] sm:$0xff] %v2729_v9  ;;  %v1016_v30 = vadd.f32 %v2600_v54, %v712_v29 }
 0x107   :  { %v1017_v15 = vadd.f32 %v2594_v40, %v713_v4  ;;  %v1019_v46 = vadd.f32 %v2597_v62, %v715_v8  ;;  %v1018_v38 = vadd.f32 %v2603_v27, %v714_v10  ;;  %v665_v12 = vmul.f32 %v2268_v43, %v2723_v7  ;;  %v2743_v8 = vpop.permute.xlu0 %489 }
 0x108   :  { %v667_v3 = vmul.f32 %v2274_v45, %v2723_v7  ;;  %v664_v61 = vmul.f32 %v2282_v48, %v2723_v7  ;;  %v666_v33 = vmul.f32 %v2288_v50, %v2723_v7  ;;  %v1080_v4 = vmax.f32 %v1016_v30, 0.0  ;;  %3401 = vst [vmem:[#allocation49_spill] sm:$0xff] %v2743_v8 }
 0x109   :  { %v1081_v63 = vmax.f32 %v1017_v15, 0.0  ;;  %v1083_v40 = vmax.f32 %v1019_v46, 0.0  ;;  %v1082_v62 = vmax.f32 %v1018_v38, 0.0  ;;  %v729_v10 = vadd.f32 %v665_v12, %v2573_v36  ;;  %v2749_v42 = vpop.permute.xlu1 %785  ;;  %v3402_v15 = vld [vmem:[#allocation21_spill] sm:$0xff] }
 0x10a   :  { %v731_v29 = vadd.f32 %v667_v3, %v2575_v55  ;;  %v728_v43 = vadd.f32 %v664_v61, %v2577_v11  ;;  %v730_v45 = vadd.f32 %v666_v33, %v2579_v13  ;;  %v1152_v48 = vpack.c.bf16 %v1088_v32, %v1080_v4  ;;  %v3403_v55 = vld [vmem:[#allocation22_spill] sm:$0xff]  ;;  %v3404_v33 = vld [vmem:[#allocation25_spill] sm:$0xff] }
 0x10b   :  { %v1153_v54 = vpack.c.bf16 %v1089_v28, %v1081_v63  ;;  %v1155_v27 = vpack.c.bf16 %v1091_v34, %v1083_v40  ;;  %v1154_v31 = vpack.c.bf16 %v1090_v56, %v1082_v62  ;;  %v337_v50 = vmul.f32 %v2364_v18, %v2729_v9 }
 0x10c   :  { %v681_v44 = vmul.f32 %v3402_v15, %v2743_v8  ;;  %v339_v36 = vmul.f32 %v2367_v19, %v2729_v9  ;;  %v683_v11 = vmul.f32 %v3403_v55, %v2743_v8  ;;  %v969_v13 = vmul.f32 %v2291_v51, %v2749_v42 }
 0x10d   :  { %1249 = vmatprep.subr.bf16.mxu0 %v1153_v54  ;;  %1322 = vmatprep.subr.bf16.mxu1 %v1155_v27  ;;  %v971_v28 = vmul.f32 %v2305_v57, %v2749_v42  ;;  %v968_v34 = vmul.f32 %v2308_v58, %v2749_v42  ;;  %v970_v56 = vmul.f32 %v2332_v6, %v2749_v42  ;;  %v2773_v38 = vpop.permute.xlu1 %789 }
 0x10e   :  { %1250 = vmatpush1.bf16.msra.mxu0 %v1152_v48  ;;  %1323 = vmatpush1.bf16.msra.mxu1 %v1154_v31  ;;  %v441_v47 = vadd.f32 %v2571_v53, %v337_v50  ;;  %v443_v49 = vadd.f32 %v2571_v53, %v339_v36  ;;  %v1033_v60 = vadd.f32 %v969_v13, %v729_v10  ;;  %v3406_v36 = vld [vmem:[#allocation26_spill] sm:$0xff] }
 0x10f   :  { %v1035_v22 = vadd.f32 %v971_v28, %v731_v29  ;;  %v1032_v46 = vadd.f32 %v968_v34, %v728_v43  ;;  %v336_v30 = vmul.f32 %v2370_v23, %v2729_v9  ;;  %v1034_v12 = vadd.f32 %v970_v56, %v730_v45  ;;  %v2785_v29 = vpop.permute.xlu0 %497 }
 0x110   :  { %v2775_v3 = vadd.f32 %v681_v44, %v441_v47  ;;  %v2777_v61 = vadd.f32 %v683_v11, %v443_v49  ;;  %v680_v63 = vmul.f32 %v3404_v33, %v2743_v8  ;;  %v977_v40 = vmul.f32 %v2291_v51, %v2773_v38  ;;  %3405 = vst [vmem:[#allocation50_spill] sm:$0xff] %v2785_v29  ;;  %v3409_v47 = vld [vmem:[#allocation57_spill] sm:$0xff] }
 0x111   :  { %v1097_v4 = vmax.f32 %v1033_v60, 0.0  ;;  %v979_v62 = vmul.f32 %v2305_v57, %v2773_v38  ;;  %v1099_v10 = vmax.f32 %v1035_v22, 0.0  ;;  %v976_v43 = vmul.f32 %v2308_v58, %v2773_v38 }
 0x112   :  { %v1096_v45 = vmax.f32 %v1032_v46, 0.0  ;;  %v978_v54 = vmul.f32 %v2332_v6, %v2773_v38  ;;  %v1098_v27 = vmax.f32 %v1034_v12, 0.0  ;;  %v1041_v48 = vadd.f32 %v977_v40, %v737_v0  ;;  %v2802_v6 = vpop.permute.xlu1 %395  ;;  %v3410_v46 = vld [vmem:[#allocation58_spill] sm:$0xff]  ;;  %v3411_v12 = vld [vmem:[#allocation59_spill] sm:$0xff] }
 0x113   :  { %v1043_v31 = vadd.f32 %v979_v62, %v739_v24  ;;  %v440_v50 = vadd.f32 %v2571_v53, %v336_v30  ;;  %v338_v51 = vmul.f32 %v2392_v37, %v2729_v9  ;;  %v1040_v57 = vadd.f32 %v976_v43, %v2725_v39  ;;  %3407 = vst [vmem:[#allocation51_spill] sm:$0xff] %v2802_v6  ;;  %v2807_v34 = vpop.permute.xlu0 %805 }
 0x114   :  { %v1042_v44 = vadd.f32 %v978_v54, %v2727_v14  ;;  %v682_v11 = vmul.f32 %v3406_v36, %v2743_v8  ;;  %v2800_v58 = vmul.f32 %v3402_v15, %v2785_v29  ;;  %v1105_v0 = vmax.f32 %v1041_v48, 0.0  ;;  %3408 = vst [vmem:[#allocation21_spill] sm:$0xff] %v2807_v34  ;;  %v3412_v54 = vld [vmem:[#allocation28_spill] sm:$0xff]  ;;  %v3426_v8 = vld [vmem:[#allocation41_spill] sm:$0xff] }
 0x115   :  { %v1107_v24 = vmax.f32 %v1043_v31, 0.0  ;;  %v2804_v13 = vadd.f32 %v680_v63, %v440_v50  ;;  %v442_v28 = vadd.f32 %v2571_v53, %v338_v51  ;;  %v1104_v39 = vmax.f32 %v1040_v57, 0.0  ;;  %v3417_v50 = vld [vmem:[#allocation30_spill] sm:$0xff] }
 0x116   :  { %v1106_v56 = vmax.f32 %v1042_v44, 0.0  ;;  %v449_v14 = vadd.f32 %v2802_v6, %v2582_v16  ;;  %v451_v49 = vadd.f32 %v2802_v6, %v3409_v47  ;;  %v1161_v60 = vpack.c.bf16 %v1105_v0, %v1097_v4  ;;  %v3414_v4 = vld [vmem:[#allocation29_spill] sm:$0xff]  ;;  %v3419_v44 = vld [vmem:[#allocation31_spill] sm:$0xff] }
 0x117   :  { %v1163_v22 = vpack.c.bf16 %v1107_v24, %v1099_v10  ;;  %v448_v30 = vadd.f32 %v2802_v6, %v3410_v46  ;;  %v450_v63 = vadd.f32 %v2802_v6, %v3411_v12  ;;  %v1160_v40 = vpack.c.bf16 %v1104_v39, %v1096_v45  ;;  %v3424_v12 = vld [vmem:[#allocation20_spill] sm:$0xff]  ;;  %v3427_v6 = vld [vmem:[#allocation42_spill] sm:$0xff] }
 0x118   :  { %v1162_v62 = vpack.c.bf16 %v1106_v56, %v1098_v27  ;;  %v2817_v43 = vadd.f32 %v682_v11, %v442_v28  ;;  %v2821_v48 = vmul.f32 %v3412_v54, %v2807_v34  ;;  %1251 = vmatprep.subr.bf16.mxu0 %v1161_v60  ;;  %v699_v16 = vmul.f32 %v3403_v55, %v2785_v29  ;;  %v2832_v27 = vpop.permute.xlu1 %493  ;;  %v3421_v56 = vld [vmem:[#allocation17_spill] sm:$0xff]  ;;  %v3422_v60 = vld [vmem:[#allocation18_spill] sm:$0xff] }
 0x119   :  { %1324 = vmatprep.subr.bf16.mxu1 %v1163_v22  ;;  %v2827_v10 = vmul.f32 %v3414_v4, %v2807_v34  ;;  %v696_v31 = vmul.f32 %v3404_v33, %v2785_v29  ;;  %v1092_v45 = vmax.f32 %v2666_v52, 0.0  ;;  %3416 = vst [vmem:[#allocation26_spill] sm:$0xff] %v2832_v27  ;;  %1252 = vmatpush1.bf16.msra.mxu0 %v1160_v40  ;;  %v1094_v0 = vmax.f32 %v2669_v1, 0.0  ;;  %v3423_v1 = vld [vmem:[#allocation19_spill] sm:$0xff] }
 0x11a   :  { %3413 = vst [vmem:[#allocation22_spill] sm:$0xff] %v2821_v48  ;;  %1325 = vmatpush1.bf16.msra.mxu1 %v1162_v62  ;;  %v2836_v51 = vmul.f32 %v3417_v50, %v2807_v34  ;;  %v698_v57 = vmul.f32 %v3406_v36, %v2785_v29  ;;  %v2842_v11 = vmul.f32 %v3419_v44, %v2807_v34  ;;  %v3425_v29 = vld [vmem:[#allocation40_spill] sm:$0xff] }
 0x11b   :  { %3415 = vst [vmem:[#allocation25_spill] sm:$0xff] %v2827_v10  ;;  %v689_v52 = vmul.f32 %v3402_v15, %v2832_v27  ;;  %v691_v24 = vmul.f32 %v3403_v55, %v2832_v27  ;;  %v688_v28 = vmul.f32 %v3404_v33, %v2832_v27  ;;  %v690_v39 = vmul.f32 %v3406_v36, %v2832_v27 }
 0x11c   :  { %3418 = vst [vmem:[#allocation57_spill] sm:$0xff] %v2836_v51  ;;  %3420 = vst [vmem:[#allocation58_spill] sm:$0xff] %v2842_v11  ;;  %v653_v47 = vmul.f32 %v3421_v56, %v2689_v2  ;;  %v655_v22 = vmul.f32 %v3422_v60, %v2689_v2  ;;  %v652_v46 = vmul.f32 %v3423_v1, %v2689_v2  ;;  %v3428_v11 = vld [vmem:[#allocation43_spill] sm:$0xff]  ;;  %v2865_v10 = vpop.permute.xlu1 %144 }
 0x11d   :  { %v654_v40 = vmul.f32 %v3424_v12, %v2689_v2  ;;  %v753_v62 = vadd.f32 %v689_v52, %v449_v14  ;;  %v755_v25 = vadd.f32 %v691_v24, %v451_v49  ;;  %v752_v32 = vadd.f32 %v688_v28, %v448_v30  ;;  %3429 = vst [vmem:[#allocation59_spill] sm:$0xff] %v2865_v10  ;;  %v3431_v52 = vld [vmem:[#allocation61_spill] sm:$0xff]  ;;  %v3432_v28 = vld [vmem:[#allocation62_spill] sm:$0xff] }
 0x11e   :  { %v754_v34 = vadd.f32 %v690_v39, %v450_v63  ;;  %v717_v53 = vadd.f32 %v653_v47, %v3425_v29  ;;  %v719_v27 = vadd.f32 %v655_v22, %v3426_v8  ;;  %v716_v9 = vadd.f32 %v652_v46, %v3427_v6  ;;  %v3430_v63 = vld [vmem:[#allocation60_spill] sm:$0xff] }
 0x11f   :  { %v718_v51 = vadd.f32 %v654_v40, %v3428_v11  ;;  %v669_v48 = vmul.f32 %v3421_v56, %v2723_v7  ;;  %v677_v2 = vmul.f32 %v3421_v56, %v2687_v5  ;;  %v973_v14 = vmul.f32 %v2373_v26, %v2749_v42  ;;  %v3433_v56 = vld [vmem:[#allocation63_spill] sm:$0xff] }
 0x120   :  { %v981_v29 = vmul.f32 %v2373_v26, %v2773_v38  ;;  %v353_v8 = vmul.f32 %v2364_v18, %v2865_v10  ;;  %v355_v6 = vmul.f32 %v2367_v19, %v2865_v10  ;;  %v352_v49 = vmul.f32 %v2370_v23, %v2865_v10 }
 0x121   :  { %v354_v30 = vmul.f32 %v2392_v37, %v2865_v10  ;;  %v1021_v11 = vadd.f32 %v3430_v63, %v717_v53  ;;  %v1023_v24 = vadd.f32 %v3431_v52, %v719_v27  ;;  %v1020_v39 = vadd.f32 %v3432_v28, %v716_v9  ;;  %v2891_v10 = vpop.permute.xlu1 %793 }
 0x122   :  { %v1022_v26 = vadd.f32 %v3433_v56, %v718_v51  ;;  %v457_v47 = vadd.f32 %v2645_v35, %v353_v8  ;;  %v459_v18 = vadd.f32 %v2645_v35, %v355_v6  ;;  %v456_v19 = vadd.f32 %v2645_v35, %v352_v49 }
 0x123   :  { %v458_v22 = vadd.f32 %v2645_v35, %v354_v30  ;;  %v1085_v23 = vmax.f32 %v1021_v11, 0.0  ;;  %v1087_v46 = vmax.f32 %v1023_v24, 0.0  ;;  %v1084_v40 = vmax.f32 %v1020_v39, 0.0 }
 0x124   :  { %v1086_v37 = vmax.f32 %v1022_v26, 0.0  ;;  %v2894_v53 = vadd.f32 %v2800_v58, %v457_v47  ;;  %v2896_v9 = vadd.f32 %v699_v16, %v459_v18  ;;  %v2898_v27 = vadd.f32 %v696_v31, %v456_v19 }
 0x125   :  { %v2900_v51 = vadd.f32 %v698_v57, %v458_v22  ;;  %v985_v8 = vmul.f32 %v3412_v54, %v2891_v10  ;;  %v987_v6 = vmul.f32 %v3414_v4, %v2891_v10  ;;  %v984_v49 = vmul.f32 %v3417_v50, %v2891_v10  ;;  %v2926_v56 = vpop.permute.xlu1 %797 }
 0x126   :  { %v986_v30 = vmul.f32 %v3419_v44, %v2891_v10  ;;  %v3434_v58 = vmax.f32 %v2674_v21, 0.0  ;;  %v3435_v31 = vmax.f32 %v2677_v20, 0.0  ;;  %v2918_v63 = vpack.c.bf16 %v1092_v45, %v1084_v40  ;;  %v3436_v21 = vld [vmem:[#allocation52_spill] sm:$0xff]  ;;  %v3437_v40 = vld [vmem:[#allocation53_spill] sm:$0xff] }
 0x127   :  { %v2920_v11 = vpack.c.bf16 %v1094_v0, %v1086_v37  ;;  %v1049_v52 = vadd.f32 %v985_v8, %v2775_v3  ;;  %v1051_v24 = vadd.f32 %v987_v6, %v2777_v61  ;;  %v1048_v28 = vadd.f32 %v984_v49, %v2804_v13 }
 0x128   :  { %v2912_v16 = vpack.c.bf16 %v3434_v58, %v1085_v23  ;;  %v2916_v57 = vpack.c.bf16 %v3435_v31, %v1087_v46  ;;  %v1050_v39 = vadd.f32 %v986_v30, %v2817_v43  ;;  %v733_v26 = vadd.f32 %v669_v48, %v3436_v21 }
 0x129   :  { %v741_v20 = vadd.f32 %v677_v2, %v2679_v41  ;;  %v671_v45 = vmul.f32 %v3422_v60, %v2723_v7  ;;  %v679_v0 = vmul.f32 %v3422_v60, %v2687_v5  ;;  %v993_v3 = vmul.f32 %v3412_v54, %v2926_v56 }
 0x12a   :  { %v1113_v61 = vmax.f32 %v1049_v52, 0.0  ;;  %v995_v13 = vmul.f32 %v3414_v4, %v2926_v56  ;;  %v1115_v43 = vmax.f32 %v1051_v24, 0.0  ;;  %v992_v47 = vmul.f32 %v3417_v50, %v2926_v56  ;;  %v2944_v6 = vpop.permute.xlu1 %405 }
 0x12b   :  { %v1112_v48 = vmax.f32 %v1048_v28, 0.0  ;;  %v994_v41 = vmul.f32 %v3419_v44, %v2926_v56  ;;  %v1114_v2 = vmax.f32 %v1050_v39, 0.0  ;;  %v1057_v18 = vadd.f32 %v993_v3, %v753_v62 }
 0x12c   :  { %v1059_v19 = vadd.f32 %v995_v13, %v755_v25  ;;  %v1037_v22 = vadd.f32 %v973_v14, %v733_v26  ;;  %v1045_v60 = vadd.f32 %v981_v29, %v741_v20  ;;  %v1056_v23 = vadd.f32 %v992_v47, %v752_v32  ;;  %v3438_v25 = vld [vmem:[#allocation68_spill] sm:$0xff]  ;;  %v3439_v29 = vld [vmem:[#allocation69_spill] sm:$0xff] }
 0x12d   :  { %v1058_v46 = vadd.f32 %v994_v41, %v754_v34  ;;  %v735_v37 = vadd.f32 %v671_v45, %v3437_v40  ;;  %v743_v8 = vadd.f32 %v679_v0, %v2681_v59  ;;  %v1121_v49 = vmax.f32 %v1057_v18, 0.0  ;;  %v3440_v59 = vld [vmem:[#allocation70_spill] sm:$0xff]  ;;  %v3441_v45 = vld [vmem:[#allocation23_spill] sm:$0xff]  ;;  %v3442_v47 = vld [vmem:[#allocation24_spill] sm:$0xff] }
 0x12e   :  { %v1123_v30 = vmax.f32 %v1059_v19, 0.0  ;;  %v1101_v58 = vmax.f32 %v1037_v22, 0.0  ;;  %v1109_v31 = vmax.f32 %v1045_v60, 0.0  ;;  %v1120_v52 = vmax.f32 %v1056_v23, 0.0  ;;  %v3443_v23 = vld [vmem:[#allocation54_spill] sm:$0xff]  ;;  %v3444_v40 = vld [vmem:[#allocation71_spill] sm:$0xff] }
 0x12f   :  { %v1122_v24 = vmax.f32 %v1058_v46, 0.0  ;;  %v465_v62 = vadd.f32 %v2944_v6, %v2648_v17  ;;  %v467_v14 = vadd.f32 %v2944_v6, %v3438_v25  ;;  %v1169_v32 = vpack.c.bf16 %v1121_v49, %v1113_v61  ;;  %v2964_v13 = vpop.permute.xlu1 %501  ;;  %v3445_v25 = vld [vmem:[#allocation22_spill] sm:$0xff] }
 0x130   :  { %v1171_v34 = vpack.c.bf16 %v1123_v30, %v1115_v43  ;;  %v464_v28 = vadd.f32 %v2944_v6, %v3439_v29  ;;  %v466_v39 = vadd.f32 %v2944_v6, %v3440_v59  ;;  %v1168_v21 = vpack.c.bf16 %v1120_v52, %v1112_v48  ;;  %v3448_v59 = vld [vmem:[#allocation58_spill] sm:$0xff] }
 0x131   :  { %v1170_v26 = vpack.c.bf16 %v1122_v24, %v1114_v2  ;;  %v2954_v20 = vpack.c.bf16 %v1109_v31, %v1101_v58  ;;  %v975_v0 = vmul.f32 %v3441_v45, %v2749_v42  ;;  %1253 = vmatprep.subr.bf16.mxu0 %v1169_v32  ;;  %v983_v17 = vmul.f32 %v3441_v45, %v2773_v38 }
 0x132   :  { %1326 = vmatprep.subr.bf16.mxu1 %v1171_v34  ;;  %v668_v3 = vmul.f32 %v3423_v1, %v2723_v7  ;;  %v676_v61 = vmul.f32 %v3423_v1, %v2687_v5  ;;  %1254 = vmatpush1.bf16.msra.mxu0 %v1168_v21  ;;  %v972_v48 = vmul.f32 %v3442_v47, %v2749_v42  ;;  %v3447_v34 = vld [vmem:[#allocation57_spill] sm:$0xff] }
 0x133   :  { %1327 = vmatpush1.bf16.msra.mxu1 %v1170_v26  ;;  %v1039_v43 = vadd.f32 %v975_v0, %v735_v37  ;;  %v980_v41 = vmul.f32 %v3442_v47, %v2773_v38  ;;  %v705_v2 = vmul.f32 %v3402_v15, %v2964_v13  ;;  %v707_v18 = vmul.f32 %v3403_v55, %v2964_v13 }
 0x134   :  { %v704_v1 = vmul.f32 %v3404_v33, %v2964_v13  ;;  %v706_v19 = vmul.f32 %v3406_v36, %v2964_v13  ;;  %v1047_v22 = vadd.f32 %v983_v17, %v743_v8  ;;  %v732_v46 = vadd.f32 %v668_v3, %v3443_v23  ;;  %v2982_v33 = vpop.permute.xlu1 %801  ;;  %v3446_v8 = vld [vmem:[#allocation25_spill] sm:$0xff] }
 0x135   :  { %v1103_v60 = vmax.f32 %v1039_v43, 0.0  ;;  %v740_v37 = vadd.f32 %v676_v61, %v3444_v40  ;;  %v769_v49 = vadd.f32 %v705_v2, %v465_v62  ;;  %v771_v30 = vadd.f32 %v707_v18, %v467_v14 }
 0x136   :  { %v768_v58 = vadd.f32 %v704_v1, %v464_v28  ;;  %v770_v31 = vadd.f32 %v706_v19, %v466_v39  ;;  %v1111_v15 = vmax.f32 %v1047_v22, 0.0  ;;  %v1036_v52 = vadd.f32 %v972_v48, %v732_v46  ;;  %v3449_v1 = vld [vmem:[#allocation55_spill] sm:$0xff] }
 0x137   :  { %v1044_v24 = vadd.f32 %v980_v41, %v740_v37  ;;  %v670_v55 = vmul.f32 %v3424_v12, %v2723_v7  ;;  %v1073_v36 = vadd.f32 %v3445_v25, %v769_v49  ;;  %v1075_v32 = vadd.f32 %v3446_v8, %v771_v30  ;;  %v3453_v37 = vld [vmem:[#allocation32_spill] sm:$0xff] }
 0x138   :  { %v1072_v29 = vadd.f32 %v3447_v34, %v768_v58  ;;  %v1074_v21 = vadd.f32 %v3448_v59, %v770_v31  ;;  %v1001_v62 = vmul.f32 %v3412_v54, %v2982_v33  ;;  %v1003_v14 = vmul.f32 %v3414_v4, %v2982_v33  ;;  %v3454_v30 = vld [vmem:[#allocation64_spill] sm:$0xff]  ;;  %v3455_v58 = vld [vmem:[#allocation51_spill] sm:$0xff] }
 0x139   :  { %v1000_v28 = vmul.f32 %v3417_v50, %v2982_v33  ;;  %v1002_v7 = vmul.f32 %v3419_v44, %v2982_v33  ;;  %v1137_v39 = vmax.f32 %v1073_v36, 0.0  ;;  %v1139_v26 = vmax.f32 %v1075_v32, 0.0  ;;  %v3459_v36 = vld [vmem:[#allocation39_spill] sm:$0xff]  ;;  %v3460_v32 = vld [vmem:[#allocation56_spill] sm:$0xff] }
 0x13a   :  { %v1136_v45 = vmax.f32 %v1072_v29, 0.0  ;;  %v1138_v0 = vmax.f32 %v1074_v21, 0.0  ;;  %v1065_v17 = vadd.f32 %v1001_v62, %v2894_v53  ;;  %v1067_v3 = vadd.f32 %v1003_v14, %v2896_v9  ;;  %v3450_v53 = vld [vmem:[#allocation72_spill] sm:$0xff]  ;;  %v3451_v9 = vld [vmem:[#allocation27_spill] sm:$0xff]  ;;  %v3461_v62 = vld [vmem:[#allocation34_spill] sm:$0xff] }
 0x13b   :  { %v1064_v61 = vadd.f32 %v1000_v28, %v2898_v27  ;;  %v1066_v54 = vadd.f32 %v1002_v7, %v2900_v51  ;;  %v1167_v43 = vpack.c.bf16 %v1111_v15, %v1103_v60  ;;  %v1100_v4 = vmax.f32 %v1036_v52, 0.0  ;;  %v3012_v15 = vld [vmem:[#allocation7] sm:$0xff]  }
 0x13c   :  { %v1108_v47 = vmax.f32 %v1044_v24, 0.0  ;;  %v678_v50 = vmul.f32 %v3424_v12, %v2687_v5  ;;  %v1129_v48 = vmax.f32 %v1065_v17, 0.0  ;;  %v1131_v44 = vmax.f32 %v1067_v3, 0.0  ;;  %v3452_v12 = vld [vmem:[#allocation48_spill] sm:$0xff]  ;;  %v3456_v52 = vld [vmem:[#allocation49_spill] sm:$0xff] }
 0x13d   :  { %v1128_v41 = vmax.f32 %v1064_v61, 0.0  ;;  %v1130_v2 = vmax.f32 %v1066_v54, 0.0  ;;  %v734_v19 = vadd.f32 %v670_v55, %v3449_v1  ;;  %v974_v27 = vmul.f32 %v3451_v9, %v2749_v42  ;;  %v3457_v42 = vld [vmem:[#allocation33_spill] sm:$0xff]  ;;  %v3458_v55 = vld [vmem:[#allocation26_spill] sm:$0xff]  ;;  %v3464_v3 = vld [vmem:[#allocation44_spill] sm:$0xff] }
 0x13e   :  { %v1164_v18 = vpack.c.bf16 %v1108_v47, %v1100_v4  ;;  %v742_v22 = vadd.f32 %v678_v50, %v3450_v53  ;;  %v1177_v23 = vpack.c.bf16 %v1137_v39, %v1129_v48  ;;  %v1179_v51 = vpack.c.bf16 %v1139_v26, %v1131_v44  ;;  %v3462_v28 = vld [vmem:[#allocation65_spill] sm:$0xff] }
 0x13f   :  { %v1176_v60 = vpack.c.bf16 %v1136_v45, %v1128_v41  ;;  %v1178_v46 = vpack.c.bf16 %v1138_v0, %v1130_v2  ;;  %v982_v40 = vmul.f32 %v3451_v9, %v2773_v38  ;;  %v1038_v5 = vadd.f32 %v974_v27, %v734_v19  ;;  %v3463_v45 = vld [vmem:[#allocation36_spill] sm:$0xff]  ;;  %v3465_v41 = vld [vmem:[#allocation35_spill] sm:$0xff]  ;;  %v3468_v53 = vld [vmem:[#allocation37_spill] sm:$0xff] }
 0x140   :  { %v341_v49 = vmul.f32 %v3453_v37, %v3452_v12  ;;  %v453_v31 = vadd.f32 %v3455_v58, %v3454_v30  ;;  %1255 = vmatprep.subr.bf16.mxu0 %v1177_v23  ;;  %1328 = vmatprep.subr.bf16.mxu1 %v1179_v51  ;;  %v685_v24 = vmul.f32 %v3457_v42, %v3456_v52  ;;  %v3466_v19 = vmov 0   ;;  %v3055_v27 = vld [vmem:[#allocation7 + $0x8] sm:$0xff]   ;;  %v3469_v51 = vld [vmem:[#allocation45_spill] sm:$0xff] }
 0x141   :  { %v693_v25 = vmul.f32 %v3457_v42, %v3458_v55  ;;  %v989_v38 = vmul.f32 %v3459_v36, %v2891_v10  ;;  %1256 = vmatpush1.bf16.msra.mxu0 %v1176_v60  ;;  %1329 = vmatpush1.bf16.msra.mxu1 %v1178_v46  ;;  %v1046_v8 = vadd.f32 %v982_v40, %v742_v22  ;;  %v1102_v59 = vmax.f32 %v1038_v5, 0.0 }
 0x142   :  { %v445_v34 = vadd.f32 %v3460_v32, %v341_v49  ;;  %v997_v29 = vmul.f32 %v3459_v36, %v2926_v56  ;;  %1395 = vmatprep.subr.bf16.mxu0 %v2912_v16  ;;  %1468 = vmatprep.subr.bf16.mxu1 %v2916_v57  ;;  %v343_v14 = vmul.f32 %v3461_v62, %v3452_v12 }
 0x143   :  { %v757_v21 = vadd.f32 %v693_v25, %v453_v31  ;;  %v455_v7 = vadd.f32 %v3455_v58, %v3462_v28  ;;  %v1110_v39 = vmax.f32 %v1046_v8, 0.0  ;;  %v687_v0 = vmul.f32 %v3463_v45, %v3456_v52  ;;  %v3471_v8 = vld [vmem:[#allocation67_spill] sm:$0xff] }
 0x144   :  { %v749_v26 = vadd.f32 %v685_v24, %v445_v34  ;;  %v695_v17 = vmul.f32 %v3463_v45, %v3458_v55  ;;  %1882 = vmatmul.mubr.msk.bf16.vlgmr.msra.gmra.mrb[0].mxu0 %vm1236_vm0, %v3012_v15  ;;  %1886 = vmatmul.mubr.msk.bf16.vlgmr.msra.gmra.mrb[0].mxu1 %vm1236_vm0, %v3012_v15  ;;  %v447_v57 = vadd.f32 %v3460_v32, %v343_v14  ;;  %v3470_v24 = vld [vmem:[#allocation38_spill] sm:$0xff] }
 0x145   :  { %v1061_v16 = vadd.f32 %v997_v29, %v757_v21  ;;  %v991_v61 = vmul.f32 %v3464_v3, %v2891_v10  ;;  %1396 = vmatpush1.bf16.msra.mxu0 %v2918_v63  ;;  %1469 = vmatpush1.bf16.msra.mxu1 %v2920_v11  ;;  %v1166_v54 = vpack.c.bf16 %v1110_v39, %v1102_v59  ;;  %v3467_v63 = vld [vmem:[#allocation66_spill] sm:$0xff] }
 0x146   :  { %v1053_v4 = vadd.f32 %v989_v38, %v749_v26  ;;  %v759_v47 = vadd.f32 %v695_v17, %v455_v7  ;;  %1397 = vmatprep.subr.bf16.mxu0 %v2954_v20  ;;  %1470 = vmatprep.subr.bf16.mxu1 %v1167_v43  ;;  %v751_v48 = vadd.f32 %v687_v0, %v447_v57  ;;  %v3472_v29 = vld [vmem:[#allocation46_spill] sm:$0xff]  ;;  %v3474_v0 = vld [vmem:[#allocation59_spill] sm:$0xff] }
 0x147   :  { %v1125_v50 = vmax.f32 %v1061_v16, 0.0  ;;  %v999_v44 = vmul.f32 %v3464_v3, %v2926_v56  ;;  %v340_v2 = vmul.f32 %v3465_v41, %v3452_v12  ;;  %1291 = vmatprep.mubr.bf16.mxu0 %v3466_v19  ;;  %1364 = vmatprep.mubr.bf16.mxu1 %v3466_v19  ;;  %v452_v11 = vadd.f32 %v3455_v58, %v3467_v63  ;;  %v3475_v16 = vld [vmem:[#allocation73_spill] sm:$0xff] }
 0x148   :  { %v1117_v1 = vmax.f32 %v1053_v4, 0.0  ;;  %v684_v20 = vmul.f32 %v3468_v53, %v3456_v52  ;;  %v692_v43 = vmul.f32 %v3468_v53, %v3458_v55  ;;  %v1055_v22 = vadd.f32 %v991_v61, %v751_v48  ;;  %v3476_v61 = vld [vmem:[#allocation50_spill] sm:$0xff]  ;;  %v3477_v48 = vld [vmem:[#allocation21_spill] sm:$0xff] }
 0x149   :  { %v1063_v9 = vadd.f32 %v999_v44, %v759_v47  ;;  %v444_v23 = vadd.f32 %v3460_v32, %v340_v2  ;;  %v988_v60 = vmul.f32 %v3469_v51, %v2891_v10  ;;  %1398 = vmatpush1.bf16.msra.mxu0 %v1164_v18  ;;  %1471 = vmatpush1.bf16.msra.mxu1 %v1166_v54  ;;  %v3094_v44 = vld [vmem:[#allocation7 + $0x10] sm:$0xff]  }
 0x14a   :  { %v1173_v46 = vpack.c.bf16 %v1125_v50, %v1117_v1  ;;  %v756_v40 = vadd.f32 %v692_v43, %v452_v11  ;;  %v996_v5 = vmul.f32 %v3469_v51, %v2926_v56  ;;  %v1119_v49 = vmax.f32 %v1055_v22, 0.0  ;;  %v3478_v11 = vld [vmem:[#allocation74_spill] sm:$0xff] }
 0x14b   :  { %v1127_v30 = vmax.f32 %v1063_v9, 0.0  ;;  %v748_v31 = vadd.f32 %v684_v20, %v444_v23  ;;  %v342_v25 = vmul.f32 %v3470_v24, %v3452_v12  ;;  %v454_v34 = vadd.f32 %v3455_v58, %v3471_v8  ;;  %v3473_v58 = vld [vmem:[#allocation47_spill] sm:$0xff] }
 0x14c   :  { %1399 = vmatprep.subr.bf16.mxu0 %v1173_v46  ;;  %v1060_v38 = vadd.f32 %v996_v5, %v756_v40  ;;  %v686_v18 = vmul.f32 %v3472_v29, %v3456_v52  ;;  %v694_v59 = vmul.f32 %v3472_v29, %v3458_v55  ;;  %1883 = vmatmul.mubr.msk.bf16.gmra.mrb[4].mxu0 %vm1236_vm0, %v3055_v27 }
 0x14d   :  { %v1175_v21 = vpack.c.bf16 %v1127_v30, %v1119_v49  ;;  %1887 = vmatmul.mubr.msk.bf16.gmra.mrb[4].mxu1 %vm1236_vm0, %v3055_v27  ;;  %v1052_v14 = vadd.f32 %v988_v60, %v748_v31  ;;  %v446_v12 = vadd.f32 %v3460_v32, %v342_v25  ;;  %v990_v39 = vmul.f32 %v3473_v58, %v2891_v10  ;;  %v3479_v31 = vld [vmem:[#allocation75_spill] sm:$0xff] }
 0x14e   :  { %v1124_v28 = vmax.f32 %v1060_v38, 0.0  ;;  %v758_v7 = vadd.f32 %v694_v59, %v454_v34  ;;  %v998_v52 = vmul.f32 %v3473_v58, %v2926_v56  ;;  %1301 = vmatprep.mubr.bf16.mxu0 %v3466_v19  ;;  %1374 = vmatprep.mubr.bf16.mxu1 %v3466_v19  ;;  %v357_v17 = vmul.f32 %v3453_v37, %v3474_v0 }
 0x14f   :  { %1472 = vmatprep.subr.bf16.mxu1 %v1175_v21  ;;  %v1116_v55 = vmax.f32 %v1052_v14, 0.0  ;;  %v750_v26 = vadd.f32 %v686_v18, %v446_v12  ;;  %v469_v32 = vadd.f32 %v2944_v6, %v3475_v16  ;;  %v701_v10 = vmul.f32 %v3457_v42, %v3476_v61 }
 0x150   :  { %v1062_v57 = vadd.f32 %v998_v52, %v758_v7  ;;  %v709_v56 = vmul.f32 %v3457_v42, %v2964_v13  ;;  %v1005_v54 = vmul.f32 %v3459_v36, %v2982_v33  ;;  %v461_v50 = vadd.f32 %v2645_v35, %v357_v17  ;;  %v1943_v52 = vld [vmem:[#allocation7 + $0x18] sm:$0xff]  }
 0x151   :  { %v1172_v4 = vpack.c.bf16 %v1124_v28, %v1116_v55  ;;  %v1054_v47 = vadd.f32 %v990_v39, %v750_v26  ;;  %v1013_v37 = vmul.f32 %v3459_v36, %v3477_v48  ;;  %v359_v63 = vmul.f32 %v3461_v62, %v3474_v0  ;;  %v3480_v26 = vld [vmem:[#allocation76_spill] sm:$0xff] }
 0x152   :  { %v1126_v2 = vmax.f32 %v1062_v57, 0.0  ;;  %v773_v1 = vadd.f32 %v709_v56, %v469_v32  ;;  %v471_v42 = vadd.f32 %v2944_v6, %v3478_v11  ;;  %v765_v43 = vadd.f32 %v701_v10, %v461_v50 }
 0x153   :  { %1400 = vmatpush1.bf16.msra.mxu0 %v1172_v4  ;;  %v1118_v20 = vmax.f32 %v1054_v47, 0.0  ;;  %v703_v22 = vmul.f32 %v3463_v45, %v3476_v61  ;;  %v711_v9 = vmul.f32 %v3463_v45, %v2964_v13  ;;  %v463_v23 = vadd.f32 %v2645_v35, %v359_v63 }
 0x154   :  { %v1077_v36 = vadd.f32 %v1013_v37, %v773_v1  ;;  %v1007_v60 = vmul.f32 %v3464_v3, %v2982_v33  ;;  %v1015_v62 = vmul.f32 %v3464_v3, %v3477_v48  ;;  %v1069_v40 = vadd.f32 %v1005_v54, %v765_v43  ;;  %1884 = vmatmul.mubr.msk.bf16.gmra.mrb[8].mxu0 %vm1236_vm0, %v3094_v44 }
 0x155   :  { %v1174_v46 = vpack.c.bf16 %v1126_v2, %v1118_v20  ;;  %v775_v5 = vadd.f32 %v711_v9, %v471_v42  ;;  %v356_v49 = vmul.f32 %v3465_v41, %v3474_v0  ;;  %v767_v45 = vadd.f32 %v703_v22, %v463_v23  ;;  %1888 = vmatmul.mubr.msk.bf16.gmra.mrb[8].mxu1 %vm1236_vm0, %v3094_v44 }
 0x156   :  { %v1141_v30 = vmax.f32 %v1077_v36, 0.0  ;;  %v468_v25 = vadd.f32 %v2944_v6, %v3479_v31  ;;  %v700_v38 = vmul.f32 %v3468_v53, %v3476_v61  ;;  %1311 = vmatprep.mubr.bf16.mxu0 %v3466_v19  ;;  %v1133_v3 = vmax.f32 %v1069_v40, 0.0  ;;  %1384 = vmatprep.mubr.bf16.mxu1 %v3466_v19  ;;  %v3179_v31 = vpop.permute.xlu0 %1193 }
 0x157   :  { %1473 = vmatpush1.bf16.msra.mxu1 %v1174_v46  ;;  %v1079_v8 = vadd.f32 %v1015_v62, %v775_v5  ;;  %v460_v41 = vadd.f32 %v2645_v35, %v356_v49  ;;  %v708_v34 = vmul.f32 %v3468_v53, %v2964_v13  ;;  %v1071_v18 = vadd.f32 %v1007_v60, %v767_v45 }
 0x158   :  { %v1004_v59 = vmul.f32 %v3469_v51, %v2982_v33  ;;  %v1012_v21 = vmul.f32 %v3469_v51, %v3477_v48  ;;  %v358_v14 = vmul.f32 %v3470_v24, %v3474_v0  ;;  %v1181_v12 = vpack.c.bf16 %v1141_v30, %v1133_v3 }
 0x159   :  { %v1143_v28 = vmax.f32 %v1079_v8, 0.0  ;;  %v764_v7 = vadd.f32 %v700_v38, %v460_v41  ;;  %v772_v39 = vadd.f32 %v708_v34, %v468_v25  ;;  %v1135_v55 = vmax.f32 %v1071_v18, 0.0 }
 0x15a   :  { %v462_v53 = vadd.f32 %v2645_v35, %v358_v14  ;;  %v470_v17 = vadd.f32 %v2944_v6, %v3480_v26  ;;  %v702_v16 = vmul.f32 %v3472_v29, %v3476_v61  ;;  %1401 = vmatprep.subr.bf16.mxu0 %v1181_v12  ;;  %v710_v24 = vmul.f32 %v3472_v29, %v2964_v13 }
 0x15b   :  { %v1068_v32 = vadd.f32 %v1004_v59, %v764_v7  ;;  %v1076_v51 = vadd.f32 %v1012_v21, %v772_v39  ;;  %v1006_v0 = vmul.f32 %v3473_v58, %v2982_v33  ;;  %v1183_v57 = vpack.c.bf16 %v1143_v28, %v1135_v55 }
 0x15c   :  { %v766_v10 = vadd.f32 %v702_v16, %v462_v53  ;;  %v1014_v35 = vmul.f32 %v3473_v58, %v3477_v48  ;;  %v774_v6 = vadd.f32 %v710_v24, %v470_v17  ;;  %1885 = vmatmul.mubr.msk.bf16.gmra.mrb[12].mxu0 %vm1236_vm0, %v1943_v52 }
 0x15d   :  { %v1132_v56 = vmax.f32 %v1068_v32, 0.0  ;;  %v1140_v54 = vmax.f32 %v1076_v51, 0.0  ;;  %1474 = vmatprep.subr.bf16.mxu1 %v1183_v57  ;;  %1889 = vmatmul.mubr.msk.bf16.gmra.mrb[12].mxu1 %vm1236_vm0, %v1943_v52 }
 0x15e   :  { %v1070_v61 = vadd.f32 %v1006_v0, %v766_v10  ;;  %v1078_v47 = vadd.f32 %v1014_v35, %v774_v6  ;;  %1427 = vmatprep.mubr.bf16.mxu0 %v3466_v19  ;;  %1500 = vmatprep.mubr.bf16.mxu1 %v3466_v19 }
 0x15f   :  { %v1180_v4 = vpack.c.bf16 %v1140_v54, %v1132_v56 }
 0x160   :  { %v1134_v13 = vmax.f32 %v1070_v61, 0.0  ;;  %v1142_v33 = vmax.f32 %v1078_v47, 0.0 }
 0x161   :  { %1402 = vmatpush1.bf16.msra.mxu0 %v1180_v4 }
 0x162   :  { %v1182_v29 = vpack.c.bf16 %v1142_v33, %v1134_v13 }
 0x164   :  { %1475 = vmatpush1.bf16.msra.mxu1 %v1182_v29  ;;  %1890 = vmatmul.mubr.msk.bf16.vlgmr.msra.gmra.mrb[16].mxu0 %vm1236_vm0, %v3012_v15  ;;  %v3193_v29 = vpop.permute.xlu0 %1205 }
 0x165   :  { %1437 = vmatprep.mubr.bf16.mxu0 %v3466_v19 }
 0x167   :  { %1894 = vmatmul.mubr.msk.bf16.vlgmr.msra.gmra.mrb[16].mxu1 %vm1236_vm0, %v3012_v15  ;;  %v3167_v15 = vpop.permute.xlu1 %1185 }
 0x168   :  { %1510 = vmatprep.mubr.bf16.mxu1 %v3466_v19 }
 0x16c   :  { %1891 = vmatmul.mubr.msk.bf16.gmra.mrb[20].mxu0 %vm1236_vm0, %v3055_v27 }
 0x16d   :  { %1447 = vmatprep.mubr.bf16.mxu0 %v3466_v19 }
 0x16f   :  { %1895 = vmatmul.mubr.msk.bf16.gmra.mrb[20].mxu1 %vm1236_vm0, %v3055_v27  ;;  %v3169_v27 = vpop.permute.xlu1 %1189 }
 0x170   :  { %1520 = vmatprep.mubr.bf16.mxu1 %v3466_v19 }
 0x173   :  { %v3181_v3 = vpop.permute.xlu1 %1197 }
 0x174   :  { %1892 = vmatmul.mubr.msk.bf16.gmra.mrb[24].mxu0 %vm1236_vm0, %v3094_v44 }
 0x175   :  { %1457 = vmatprep.mubr.bf16.mxu0 %v3466_v19 }
 0x177   :  { %1896 = vmatmul.mubr.msk.bf16.gmra.mrb[24].mxu1 %vm1236_vm0, %v3094_v44  ;;  %v3191_v10 = vpop.permute.xlu1 %1201 }
 0x178   :  { %1530 = vmatprep.mubr.bf16.mxu1 %v3466_v19 }
 0x17c   :  { %1893 = vmatmul.mubr.msk.bf16.gmra.mrb[28].mxu0 %vm1236_vm0, %v1943_v52 }
 0x17d   :  { %1683 = vmatprep.mubr.bf16.mxu0 %v3466_v19 }
 0x17f   :  { %1897 = vmatmul.mubr.msk.bf16.gmra.mrb[28].mxu1 %vm1236_vm0, %v1943_v52 }
 0x180   :  { %1724 = vmatprep.mubr.bf16.mxu1 %v3466_v19 }
 0x217   :  { %v1283_v58 = vpop.f32.mrb[0].mxu0  ;;  %v1356_v50 = vpop.f32.mrb[0].mxu1 }
 0x218   :  { %v1284_v48 = vadd.f32 %v1283_v58, %v3167_v15  ;;  %v1357_v37 = vadd.f32 %v1356_v50, %v3167_v15  ;;  %v1285_v44 = vpop.f32.mrb[1].mxu0  ;;  %v1358_v2 = vpop.f32.mrb[1].mxu1 }
 0x219   :  { %v1286_v1 = vadd.f32 %v1285_v44, %v3167_v15  ;;  %v1359_v63 = vadd.f32 %v1358_v2, %v3167_v15  ;;  %v1287_v11 = vpop.f32.mrb[2].mxu0  ;;  %v1360_v42 = vpop.f32.mrb[2].mxu1 }
 0x21a   :  { %v1288_v20 = vadd.f32 %v1287_v11, %v3169_v27  ;;  %v1361_v43 = vadd.f32 %v1360_v42, %v3169_v27  ;;  %v1289_v22 = vpop.f32.mrb[3].mxu0  ;;  %v1362_v9 = vpop.f32.mrb[3].mxu1  ;;  %v1541_v60 = vmax.f32 %v1284_v48, 0.0  ;;  %v1543_v62 = vmax.f32 %v1357_v37, 0.0 }
 0x21b   :  { %v1290_v36 = vadd.f32 %v1289_v22, %v3169_v27  ;;  %v1363_v23 = vadd.f32 %v1362_v9, %v3169_v27  ;;  %v1542_v5 = vmax.f32 %v1286_v1, 0.0  ;;  %v1544_v49 = vmax.f32 %v1359_v63, 0.0 }
 0x21c   :  { %v1549_v46 = vmax.f32 %v1288_v20, 0.0  ;;  %v1551_v40 = vmax.f32 %v1361_v43, 0.0 }
 0x21d   :  { %v1550_v30 = vmax.f32 %v1290_v36, 0.0  ;;  %v1552_v45 = vmax.f32 %v1363_v23, 0.0 }
 0x21e   :  { %v1606_v25 = vpack.c.bf16 %v1549_v46, %v1541_v60  ;;  %v1608_v38 = vpack.c.bf16 %v1551_v40, %v1543_v62  ;;  %v3203_v62 = vpop.permute.xlu1 %1209 }
 0x21f   :  { %v1607_v8 = vpack.c.bf16 %v1550_v30, %v1542_v5  ;;  %v1609_v41 = vpack.c.bf16 %v1552_v45, %v1544_v49  ;;  %v1293_v34 = vpop.f32.mrb[4].mxu0 }
 0x220   :  { %v1366_v18 = vpop.f32.mrb[4].mxu1  ;;  %v1295_v59 = vpop.f32.mrb[5].mxu0  ;;  %v1294_v14 = vadd.f32 %v1293_v34, %v3179_v31 }
 0x221   :  { %v1368_v21 = vpop.f32.mrb[5].mxu1  ;;  %v1367_v12 = vadd.f32 %v1366_v18, %v3179_v31  ;;  %v1296_v28 = vadd.f32 %v1295_v59, %v3179_v31  ;;  %v1297_v39 = vpop.f32.mrb[6].mxu0  ;;  %1651 = vmatprep.subr.bf16.mxu0 %v1607_v8  ;;  %1692 = vmatprep.subr.bf16.mxu1 %v1609_v41 }
 0x222   :  { %v1369_v7 = vadd.f32 %v1368_v21, %v3179_v31  ;;  %v1370_v52 = vpop.f32.mrb[6].mxu1  ;;  %v1298_v55 = vadd.f32 %v1297_v39, %v3181_v3  ;;  %v1299_v26 = vpop.f32.mrb[7].mxu0  ;;  %1652 = vmatpush1.bf16.msra.mxu0 %v1606_v25  ;;  %1693 = vmatpush1.bf16.msra.mxu1 %v1608_v38  ;;  %v1557_v51 = vmax.f32 %v1294_v14, 0.0 }
 0x223   :  { %v1371_v53 = vadd.f32 %v1370_v52, %v3181_v3  ;;  %v1372_v17 = vpop.f32.mrb[7].mxu1  ;;  %v1300_v16 = vadd.f32 %v1299_v26, %v3181_v3  ;;  %v1559_v0 = vmax.f32 %v1367_v12, 0.0  ;;  %v1558_v35 = vmax.f32 %v1296_v28, 0.0  ;;  %v3205_v41 = vpop.permute.xlu0 %1213 }
 0x224   :  { %v1373_v32 = vadd.f32 %v1372_v17, %v3181_v3  ;;  %v1565_v24 = vmax.f32 %v1298_v55, 0.0  ;;  %v1560_v56 = vmax.f32 %v1369_v7, 0.0 }
 0x225   :  { %v1567_v57 = vmax.f32 %v1371_v53, 0.0  ;;  %v1566_v54 = vmax.f32 %v1300_v16, 0.0 }
 0x226   :  { %v1568_v6 = vmax.f32 %v1373_v32, 0.0  ;;  %v1614_v61 = vpack.c.bf16 %v1565_v24, %v1557_v51 }
 0x227   :  { %v1616_v4 = vpack.c.bf16 %v1567_v57, %v1559_v0  ;;  %v1615_v47 = vpack.c.bf16 %v1566_v54, %v1558_v35  ;;  %v1303_v33 = vpop.f32.mrb[8].mxu0 }
 0x228   :  { %v1617_v13 = vpack.c.bf16 %v1568_v6, %v1560_v56  ;;  %v1304_v58 = vadd.f32 %v1303_v33, %v3191_v10  ;;  %v1376_v50 = vpop.f32.mrb[8].mxu1  ;;  %v1305_v48 = vpop.f32.mrb[9].mxu0 }
 0x229   :  { %v1377_v37 = vadd.f32 %v1376_v50, %v3191_v10  ;;  %v1306_v44 = vadd.f32 %v1305_v48, %v3191_v10  ;;  %v1378_v2 = vpop.f32.mrb[9].mxu1  ;;  %v1307_v1 = vpop.f32.mrb[10].mxu0  ;;  %1653 = vmatprep.subr.bf16.mxu0 %v1615_v47 }
 0x22a   :  { %1694 = vmatprep.subr.bf16.mxu1 %v1617_v13  ;;  %v1379_v63 = vadd.f32 %v1378_v2, %v3191_v10  ;;  %v1308_v11 = vadd.f32 %v1307_v1, %v3193_v29  ;;  %v1380_v42 = vpop.f32.mrb[10].mxu1  ;;  %v1309_v20 = vpop.f32.mrb[11].mxu0  ;;  %1654 = vmatpush1.bf16.msra.mxu0 %v1614_v61  ;;  %v1573_v36 = vmax.f32 %v1304_v58, 0.0 }
 0x22b   :  { %1695 = vmatpush1.bf16.msra.mxu1 %v1616_v4  ;;  %v1381_v43 = vadd.f32 %v1380_v42, %v3193_v29  ;;  %v1310_v22 = vadd.f32 %v1309_v20, %v3193_v29  ;;  %v1382_v9 = vpop.f32.mrb[11].mxu1  ;;  %v1575_v46 = vmax.f32 %v1377_v37, 0.0  ;;  %v1574_v40 = vmax.f32 %v1306_v44, 0.0 }
 0x22c   :  { %v1581_v23 = vmax.f32 %v1308_v11, 0.0  ;;  %v1383_v60 = vadd.f32 %v1382_v9, %v3193_v29  ;;  %v1576_v30 = vmax.f32 %v1379_v63, 0.0  ;;  %v3218_v11 = vld [vmem:[#allocation8] sm:$0x1] }
 0x22d   :  { %v1583_v5 = vmax.f32 %v1381_v43, 0.0  ;;  %v1582_v49 = vmax.f32 %v1310_v22, 0.0 }
 0x22e   :  { %v1622_v45 = vpack.c.bf16 %v1581_v23, %v1573_v36  ;;  %v1584_v25 = vmax.f32 %v1383_v60, 0.0 }
 0x22f   :  { %v1624_v38 = vpack.c.bf16 %v1583_v5, %v1575_v46  ;;  %v1623_v8 = vpack.c.bf16 %v1582_v49, %v1574_v40  ;;  %v1313_v34 = vpop.f32.mrb[12].mxu0 }
 0x230   :  { %v1625_v18 = vpack.c.bf16 %v1584_v25, %v1576_v30  ;;  %v1314_v59 = vadd.f32 %v1313_v34, %v3203_v62  ;;  %v1386_v21 = vpop.f32.mrb[12].mxu1  ;;  %v1315_v14 = vpop.f32.mrb[13].mxu0 }
 0x231   :  { %v1387_v12 = vadd.f32 %v1386_v21, %v3203_v62  ;;  %v1316_v28 = vadd.f32 %v1315_v14, %v3203_v62  ;;  %v1388_v7 = vpop.f32.mrb[13].mxu1  ;;  %v1317_v39 = vpop.f32.mrb[14].mxu0  ;;  %1655 = vmatprep.subr.bf16.mxu0 %v1623_v8 }
 0x232   :  { %v1389_v52 = vadd.f32 %v1388_v7, %v3203_v62  ;;  %v1318_v55 = vadd.f32 %v1317_v39, %v3205_v41  ;;  %v1390_v53 = vpop.f32.mrb[14].mxu1  ;;  %1696 = vmatprep.subr.bf16.mxu1 %v1625_v18  ;;  %v1319_v26 = vpop.f32.mrb[15].mxu0  ;;  %1656 = vmatpush1.bf16.msra.mxu0 %v1622_v45  ;;  %v1589_v51 = vmax.f32 %v1314_v59, 0.0 }
 0x233   :  { %v1391_v17 = vadd.f32 %v1390_v53, %v3205_v41  ;;  %v1320_v16 = vadd.f32 %v1319_v26, %v3205_v41  ;;  %v1392_v32 = vpop.f32.mrb[15].mxu1  ;;  %1697 = vmatpush1.bf16.msra.mxu1 %v1624_v38  ;;  %v1591_v57 = vmax.f32 %v1387_v12, 0.0  ;;  %v1590_v35 = vmax.f32 %v1316_v28, 0.0 }
 0x234   :  { %v1597_v24 = vmax.f32 %v1318_v55, 0.0  ;;  %v1393_v0 = vadd.f32 %v1392_v32, %v3205_v41  ;;  %v1592_v6 = vmax.f32 %v1389_v52, 0.0 }
 0x235   :  { %v1599_v56 = vmax.f32 %v1391_v17, 0.0  ;;  %v1598_v54 = vmax.f32 %v1320_v16, 0.0 }
 0x236   :  { %v1630_v61 = vpack.c.bf16 %v1597_v24, %v1589_v51  ;;  %v1600_v4 = vmax.f32 %v1393_v0, 0.0 }
 0x237   :  { %v1632_v47 = vpack.c.bf16 %v1599_v56, %v1591_v57  ;;  %v1631_v13 = vpack.c.bf16 %v1598_v54, %v1590_v35  ;;  %v1429_v33 = vpop.f32.mrb[16].mxu0 }
 0x238   :  { %v1633_v58 = vpack.c.bf16 %v1600_v4, %v1592_v6  ;;  %v1430_v50 = vadd.f32 %v1429_v33, %v3167_v15  ;;  %v1431_v48 = vpop.f32.mrb[17].mxu0 }
 0x239   :  { %v1432_v37 = vadd.f32 %v1431_v48, %v3167_v15  ;;  %v1433_v44 = vpop.f32.mrb[18].mxu0  ;;  %1657 = vmatprep.subr.bf16.mxu0 %v1631_v13 }
 0x23a   :  { %v1502_v2 = vpop.f32.mrb[16].mxu1  ;;  %v1434_v1 = vadd.f32 %v1433_v44, %v3169_v27  ;;  %1698 = vmatprep.subr.bf16.mxu1 %v1633_v58  ;;  %v1435_v63 = vpop.f32.mrb[19].mxu0  ;;  %1658 = vmatpush1.bf16.msra.mxu0 %v1630_v61  ;;  %v1545_v22 = vmax.f32 %v1430_v50, 0.0 }
 0x23b   :  { %v1503_v42 = vadd.f32 %v1502_v2, %v3167_v15  ;;  %v1504_v20 = vpop.f32.mrb[17].mxu1  ;;  %v1436_v43 = vadd.f32 %v1435_v63, %v3169_v27  ;;  %1699 = vmatpush1.bf16.msra.mxu1 %v1632_v47  ;;  %v1546_v60 = vmax.f32 %v1432_v37, 0.0 }
 0x23c   :  { %v1505_v9 = vadd.f32 %v1504_v20, %v3167_v15  ;;  %v1553_v36 = vmax.f32 %v1434_v1, 0.0  ;;  %v1506_v23 = vpop.f32.mrb[18].mxu1 }
 0x23d   :  { %v1507_v46 = vadd.f32 %v1506_v23, %v3169_v27  ;;  %v1554_v40 = vmax.f32 %v1436_v43, 0.0  ;;  %v1508_v5 = vpop.f32.mrb[19].mxu1  ;;  %1898 = vmatmul.mubr.msk.bf16.vlgmr.msra.gmra.mrb[32].mxu0 %vm1236_vm0, %v3218_v11  ;;  %v1547_v45 = vmax.f32 %v1503_v42, 0.0 }
 0x23e   :  { %v1610_v49 = vpack.c.bf16 %v1553_v36, %v1545_v22  ;;  %v1509_v30 = vadd.f32 %v1508_v5, %v3169_v27  ;;  %1899 = vmatmul.mubr.msk.bf16.vlgmr.msra.gmra.mrb[32].mxu1 %vm1236_vm0, %v3218_v11  ;;  %1765 = vmatprep.mubr.bf16.mxu0 %v3466_v19  ;;  %v1548_v8 = vmax.f32 %v1505_v9, 0.0 }
 0x23f   :  { %v1555_v15 = vmax.f32 %v1507_v46, 0.0  ;;  %v1611_v25 = vpack.c.bf16 %v1554_v40, %v1546_v60  ;;  %v1439_v38 = vpop.f32.mrb[20].mxu0  ;;  %1806 = vmatprep.mubr.bf16.mxu1 %v3466_v19 }
 0x240   :  { %v1556_v34 = vmax.f32 %v1509_v30, 0.0  ;;  %v1440_v18 = vadd.f32 %v1439_v38, %v3179_v31  ;;  %v1441_v59 = vpop.f32.mrb[21].mxu0 }
 0x241   :  { %v1612_v21 = vpack.c.bf16 %v1555_v15, %v1547_v45  ;;  %v1442_v14 = vadd.f32 %v1441_v59, %v3179_v31  ;;  %v1443_v27 = vpop.f32.mrb[22].mxu0  ;;  %1733 = vmatprep.subr.bf16.mxu0 %v1611_v25 }
 0x242   :  { %v1613_v12 = vpack.c.bf16 %v1556_v34, %v1548_v8  ;;  %v1512_v28 = vpop.f32.mrb[20].mxu1  ;;  %v1444_v7 = vadd.f32 %v1443_v27, %v3181_v3  ;;  %v1445_v39 = vpop.f32.mrb[23].mxu0  ;;  %1734 = vmatpush1.bf16.msra.mxu0 %v1610_v49  ;;  %v1561_v53 = vmax.f32 %v1440_v18, 0.0 }
 0x243   :  { %v1513_v52 = vadd.f32 %v1512_v28, %v3179_v31  ;;  %v1514_v55 = vpop.f32.mrb[21].mxu1  ;;  %v1446_v19 = vadd.f32 %v1445_v39, %v3181_v3  ;;  %v1562_v32 = vmax.f32 %v1442_v14, 0.0 }
 0x244   :  { %v1515_v26 = vadd.f32 %v1514_v55, %v3179_v31  ;;  %v1569_v17 = vmax.f32 %v1444_v7, 0.0  ;;  %v1516_v16 = vpop.f32.mrb[22].mxu1  ;;  %1774 = vmatprep.subr.bf16.mxu1 %v1613_v12 }
 0x245   :  { %v1517_v51 = vadd.f32 %v1516_v16, %v3181_v3  ;;  %v1570_v24 = vmax.f32 %v1446_v19, 0.0  ;;  %v1518_v0 = vpop.f32.mrb[23].mxu1  ;;  %1775 = vmatpush1.bf16.msra.mxu1 %v1612_v21  ;;  %v1563_v56 = vmax.f32 %v1513_v52, 0.0 }
 0x246   :  { %v1618_v57 = vpack.c.bf16 %v1569_v17, %v1561_v53  ;;  %v1519_v35 = vadd.f32 %v1518_v0, %v3181_v3  ;;  %v1564_v4 = vmax.f32 %v1515_v26, 0.0 }
 0x247   :  { %v1571_v54 = vmax.f32 %v1517_v51, 0.0  ;;  %v1619_v6 = vpack.c.bf16 %v1570_v24, %v1562_v32  ;;  %v1449_v61 = vpop.f32.mrb[24].mxu0 }
 0x248   :  { %v1572_v47 = vmax.f32 %v1519_v35, 0.0  ;;  %v1450_v31 = vadd.f32 %v1449_v61, %v3191_v10  ;;  %v1451_v13 = vpop.f32.mrb[25].mxu0 }
 0x249   :  { %v1620_v33 = vpack.c.bf16 %v1571_v54, %v1563_v56  ;;  %v1452_v58 = vadd.f32 %v1451_v13, %v3191_v10  ;;  %v1453_v50 = vpop.f32.mrb[26].mxu0  ;;  %1735 = vmatprep.subr.bf16.mxu0 %v1619_v6  ;;  %v1643_v54 = vpop.permute.xlu1 %1642 }
 0x24a   :  { %v1621_v48 = vpack.c.bf16 %v1572_v47, %v1564_v4  ;;  %v1522_v37 = vpop.f32.mrb[24].mxu1  ;;  %v1454_v44 = vadd.f32 %v1453_v50, %v3193_v29  ;;  %v1455_v2 = vpop.f32.mrb[27].mxu0  ;;  %1736 = vmatpush1.bf16.msra.mxu0 %v1618_v57  ;;  %v1577_v42 = vmax.f32 %v1450_v31, 0.0  ;;  %v1644_v6 = vrot.slane %v1643_v54, 7 }
 0x24b   :  { %v1523_v3 = vadd.f32 %v1522_v37, %v3191_v10  ;;  %v1524_v1 = vpop.f32.mrb[25].mxu1  ;;  %v1456_v63 = vadd.f32 %v1455_v2, %v3193_v29  ;;  %v1578_v9 = vmax.f32 %v1452_v58, 0.0  ;;  %v1640_v4 = vpop.permute.xlu0 %1639 }
 0x24c   :  { %v1525_v20 = vadd.f32 %v1524_v1, %v3191_v10  ;;  %v1585_v43 = vmax.f32 %v1454_v44, 0.0  ;;  %v1526_v22 = vpop.f32.mrb[26].mxu1  ;;  %1776 = vmatprep.subr.bf16.mxu1 %v1621_v48  ;;  %v1646_v47 = vsel %vm1645_vm1, %v1644_v6, %v1640_v4  ;;  %v3481_v44 = vld [vmem:[#allocation16_spill] sm:$0xff] }
 0x24d   :  { %v1527_v36 = vadd.f32 %v1526_v22, %v3193_v29  ;;  %v1586_v23 = vmax.f32 %v1456_v63, 0.0  ;;  %v1528_v60 = vpop.f32.mrb[27].mxu1  ;;  %1777 = vmatpush1.bf16.msra.mxu1 %v1620_v33  ;;  %v1579_v5 = vmax.f32 %v1523_v3, 0.0 }
 0x24e   :  { %v1626_v46 = vpack.c.bf16 %v1585_v43, %v1577_v42  ;;  %v1529_v40 = vadd.f32 %v1528_v60, %v3193_v29  ;;  %v1580_v15 = vmax.f32 %v1525_v20, 0.0 }
 0x24f   :  { %v1587_v49 = vmax.f32 %v1527_v36, 0.0  ;;  %v1627_v30 = vpack.c.bf16 %v1586_v23, %v1578_v9  ;;  %v1459_v45 = vpop.f32.mrb[28].mxu0 }
 0x250   :  { %v1588_v25 = vmax.f32 %v1529_v40, 0.0  ;;  %v1460_v10 = vadd.f32 %v1459_v45, %v3203_v62  ;;  %v1461_v38 = vpop.f32.mrb[29].mxu0 }
 0x251   :  { %v1628_v8 = vpack.c.bf16 %v1587_v49, %v1579_v5  ;;  %v1462_v34 = vadd.f32 %v1461_v38, %v3203_v62  ;;  %v1463_v18 = vpop.f32.mrb[30].mxu0  ;;  %1737 = vmatprep.subr.bf16.mxu0 %v1627_v30 }
 0x252   :  { %v1629_v59 = vpack.c.bf16 %v1588_v25, %v1580_v15  ;;  %v1532_v21 = vpop.f32.mrb[28].mxu1  ;;  %v1464_v14 = vadd.f32 %v1463_v18, %v3205_v41  ;;  %v1465_v27 = vpop.f32.mrb[31].mxu0  ;;  %1738 = vmatpush1.bf16.msra.mxu0 %v1626_v46  ;;  %v1593_v7 = vmax.f32 %v1460_v10, 0.0 }
 0x253   :  { %v1533_v29 = vadd.f32 %v1532_v21, %v3203_v62  ;;  %v1534_v12 = vpop.f32.mrb[29].mxu1  ;;  %v1466_v28 = vadd.f32 %v1465_v27, %v3205_v41  ;;  %v1594_v19 = vmax.f32 %v1462_v34, 0.0 }
 0x254   :  { %v1535_v39 = vadd.f32 %v1534_v12, %v3203_v62  ;;  %v1601_v52 = vmax.f32 %v1464_v14, 0.0  ;;  %v1536_v55 = vpop.f32.mrb[30].mxu1  ;;  %1778 = vmatprep.subr.bf16.mxu1 %v1629_v59 }
 0x255   :  { %v1537_v53 = vadd.f32 %v1536_v55, %v3205_v41  ;;  %v1602_v26 = vmax.f32 %v1466_v28, 0.0  ;;  %v1538_v17 = vpop.f32.mrb[31].mxu1  ;;  %1779 = vmatpush1.bf16.msra.mxu1 %v1628_v8  ;;  %v1595_v51 = vmax.f32 %v1533_v29, 0.0 }
 0x256   :  { %v1634_v16 = vpack.c.bf16 %v1601_v52, %v1593_v7  ;;  %v1539_v32 = vadd.f32 %v1538_v17, %v3205_v41  ;;  %v1596_v57 = vmax.f32 %v1535_v39, 0.0  ;;  %v2098_v41 = vmov 1983009808  }
 0x257   :  { %v1603_v24 = vmax.f32 %v1537_v53, 0.0  ;;  %v1635_v0 = vpack.c.bf16 %v1602_v26, %v1594_v19  ;;  %v1826_v61 = vunpack.c.l.s4 %v2098_v41 }
 0x258   :  { %v1604_v35 = vmax.f32 %v1539_v32, 0.0 }
 0x259   :  { %v1636_v56 = vpack.c.bf16 %v1603_v24, %v1595_v51  ;;  %1739 = vmatprep.subr.bf16.mxu0 %v1635_v0  ;;  %v1827_v31 = vunpack.c.0.s8 %v1826_v61 }
 0x25a   :  { %v1637_v62 = vpack.c.bf16 %v1604_v35, %v1596_v57  ;;  %1740 = vmatpush1.bf16.msra.mxu0 %v1634_v16 }
 0x25b   :  { %v1830_v2 = vsub.s32 %v1827_v31, %v3481_v44 }
 0x25c   :  { %1780 = vmatprep.subr.bf16.mxu1 %v1637_v62 }
 0x25d   :  { %1781 = vmatpush1.bf16.msra.mxu1 %v1636_v56  ;;  %1900 = vmatmul.mubr.msk.bf16.vlgmr.msra.gmra.mrb[36].mxu0 %vm1236_vm0, %v3218_v11 }
 0x260   :  { %1901 = vmatmul.mubr.msk.bf16.vlgmr.msra.gmra.mrb[36].mxu1 %vm1236_vm0, %v3218_v11 }
 0x310   :  { %v1685_v13 = vpop.f32.mrb[32].mxu0 }
 0x311   :  { %v1726_v33 = vpop.f32.mrb[32].mxu1  ;;  %v1687_v58 = vpop.f32.mrb[33].mxu0  ;;  %v1686_v50 = vadd.f32 %v1685_v13, %v1646_v47 }
 0x312   :  { %v1728_v48 = vpop.f32.mrb[33].mxu1  ;;  %v1689_v37 = vpop.f32.mrb[34].mxu0  ;;  %v1688_v3 = vadd.f32 %v1687_v58, %v1646_v47  ;;  %v1727_v1 = vadd.f32 %v1726_v33, %v1646_v47 }
 0x313   :  { %v1730_v63 = vpop.f32.mrb[34].mxu1  ;;  %v1690_v11 = vpop.f32.mrb[35].mxu0  ;;  %v1729_v42 = vadd.f32 %v1728_v48, %v1646_v47 }
 0x314   :  { %v1731_v20 = vpop.f32.mrb[35].mxu1  ;;  %v1823_v43 = vcombine.low %v1686_v50, %v1688_v3 }
 0x315   :  { %v1824_v22 = vcombine.low %v1727_v1, %v1729_v42 }
 0x316   :  { %v1831_v9 = vrot.slane %v1823_v43, %v1830_v2 }
 0x317   :  { %v1838_v36 = vrot.slane %v1824_v22, %v1830_v2 }
 0x319   :  { %v1839_v23 = vcombine.low %v1831_v9, %v1838_v36 }
 0x31b   :  { %1859 = vst [vmem:[#allocation11] sm:$0xff] %v1839_v23 }
 0x330   :  { %v1767_v60 = vpop.f32.mrb[36].mxu0 }
 0x331   :  { %v1768_v46 = vadd.f32 %v1767_v60, %v1646_v47  ;;  %v1769_v40 = vpop.f32.mrb[37].mxu0 }
 0x332   :  { %v1770_v5 = vadd.f32 %v1769_v40, %v1646_v47  ;;  %v1771_v49 = vpop.f32.mrb[38].mxu0 }
 0x333   :  { %v1808_v30 = vpop.f32.mrb[36].mxu1  ;;  %v1772_v45 = vpop.f32.mrb[39].mxu0 }
 0x334   :  { %v1809_v15 = vadd.f32 %v1808_v30, %v1646_v47  ;;  %v1840_v25 = vcombine.low %v1768_v46, %v1770_v5  ;;  %v1810_v10 = vpop.f32.mrb[37].mxu1 }
 0x335   :  { %v1811_v38 = vadd.f32 %v1810_v10, %v1646_v47  ;;  %v1812_v8 = vpop.f32.mrb[38].mxu1 }
 0x336   :  { %v1813_v34 = vpop.f32.mrb[39].mxu1  ;;  %v1848_v18 = vrot.slane %v1840_v25, %v1830_v2 }
 0x337   :  { %v1841_v59 = vcombine.low %v1809_v15, %v1811_v38 }
 0x339   :  { %v1855_v21 = vrot.slane %v1841_v59, %v1830_v2 }
 0x33b   :  { %v1856_v14 = vcombine.low %v1848_v18, %v1855_v21 }
 0x33d   :  { %1860 = vst [vmem:[#allocation11 + $0x8] sm:$0xff] %v1856_v14 }
 0x33e   :  { %2065 = shalt.err (!%p2062_p2)
}
 0x33f   :  { %s2066_s11 = scalar_lea.hbm %s3277_s5, 256 }
 0x340   :  { %p2067_p3 = scmp.ne.s32.totalorder %s3277_s5, %s2066_s11  ;;  %p2070_p4 = scmp.lt.u32.totalorder %s2066_s11, %s3277_s5 }
 0x342   :  { %p2072_p5 = pnand %p2070_p4, %p2067_p3 }
 0x344   :  { %2075 = shalt.err (!%p2072_p5)
}
 0x345   :  { %1870 = dma.vmem_to_hbm [thread:$0]  %s1868_s28, 256, %s3277_s5, [#allocation4]  }
 0x346   :  { %2082 = dma.done.wait [#allocation4], 256  }
 0x347   :  { %2083 = vsyncadd [#allocation4], 4294967040 }
 0x348   :  { %1874 = vsyncpa [#allocation3], 1 }
 0x349   :  { %1875 = vsyncpa [#allocation6], 1 }
 0x34a   :  { %1876 = vsyncpa [#allocation9], 1 }
 0x34b   :  { %1877 = vsyncpa [#allocation4], 1 }

</bundles_post_ra>
